<compile_context>
chip_gen: v6e
topology: v6e:2x2x1
jax: 0.10.0
libtpu: 0.0.40
codegen_flags: <defaults>
</compile_context>

<pallas_src>
import jax
import jax.numpy as jnp
from jax import lax
from jax.experimental import pallas as pl
from jax.experimental.pallas import tpu as pltpu

KERNEL_SIZE = [8, 5, 3]
EPS = 0.001  # BatchNorm epsilon (momentum only affects running stats, not the fwd output)


def _ceil_to(v, m):
    return ((v + m - 1) // m) * m


# ---------------------------------------------------------------------------
# Wrapper: builds the fused kernel for the given static shapes and calls it.
# ---------------------------------------------------------------------------
def block_fcn_forward(x, params):
    """x: (B, C_in=1, T) float32 (PyTorch NCL). Returns (B, C_out, 1)."""
    (w1, _b1, g1, be1), (w2, _b2, g2, be2), (w3, _b3, g3, be3) = params
    B, _, T0 = x.shape
    C1, _, K1 = w1.shape
    C2, _, K2 = w2.shape
    C3, _, K3 = w3.shape
    T1 = T0 - K1 + 1
    T2 = T1 - K2 + 1
    T3 = T2 - K3 + 1
    assert T3 >= 1

    # Padded time extents: each slab is sublane-aligned and large enough that all
    # shifted tap slices of the *next* layer stay in-bounds.
    T3P = _ceil_to(T3, 8)                                   # z3/h3 are f32
    T2P = _ceil_to(max(T2, T3P + K3 - 1), 16)               # h2 is bf16
    T1P = _ceil_to(max(T1, T2P + K2 - 1), 16)               # h1 is bf16
    TXP = _ceil_to(max(T0, T1P + K1 - 1), 8)

    # Input channels-last, zero-padded along time: (B, TXP, 1).
    xt = jnp.transpose(x, (0, 2, 1))
    xt = jnp.pad(xt, ((0, 0), (0, TXP - T0), (0, 0))).astype(jnp.float32)

    # Weight layouts.
    #   layer 1: (K1, C1) f32, used as K1 VPU FMA rows (no MXU).
    #   layers 2/3: im2col-flattened (K*C_in, C_out) bf16, row index = j*C_in + c.
    w1m = jnp.transpose(w1[:, 0, :], (1, 0)).astype(jnp.float32)                  # (K1, C1)
    w2f = jnp.transpose(w2, (2, 1, 0)).reshape(K2 * C1, C2).astype(jnp.bfloat16)  # (640, 256)
    w3f = jnp.transpose(w3, (2, 1, 0)).reshape(K3 * C2, C3).astype(jnp.bfloat16)  # (768, 128)
    gb1 = jnp.stack([g1, be1]).astype(jnp.float32)                                # (2, C1)
    gb2 = jnp.stack([g2, be2]).astype(jnp.float32)                                # (2, C2)
    gb3 = jnp.stack([g3, be3]).astype(jnp.float32)                                # (2, C3)
    # NOTE: conv biases (_b1, _b2, _b3) intentionally NOT passed: they cancel under
    # train-mode BatchNorm's batch-mean subtraction.  (Must be reintroduced if an
    # eval/running-stats path is ever added.)

    def kernel(x_ref, w1_ref, gb1_ref, w2_ref, gb2_ref, w3_ref, gb3_ref, o_ref):
        f32 = jnp.float32

        def bn_relu(z, gb_ref, t_valid):
            # Train-mode BatchNorm1d: per-channel stats over (batch, valid time),
            # biased variance, one-pass sum/sumsq (fine at this scale; use two-pass
            # per-tile stats when the M axis gets tiled), fused FMA epilogue + ReLU.
            tp, c = z.shape[1], z.shape[2]
            t_idx = lax.broadcasted_iota(jnp.int32, (1, tp, 1), 1)
            mask = (t_idx < t_valid).astype(f32)                              # (1, tp, 1)
            zm = z * mask
            s = jnp.sum(jnp.sum(zm, axis=1, keepdims=True), axis=0, keepdims=True)       # (1,1,c)
            ss = jnp.sum(jnp.sum(zm * z, axis=1, keepdims=True), axis=0, keepdims=True)  # (1,1,c)
            n_inv = 1.0 / float(B * t_valid)
            mean = s * n_inv
            var = jnp.maximum(ss * n_inv - mean * mean, 0.0)
            gamma = gb_ref[0:1, :].reshape(1, 1, c)
            beta = gb_ref[1:2, :].reshape(1, 1, c)
            scale = gamma * lax.rsqrt(var + EPS)
            shift = beta - mean * scale
            return jnp.maximum(z * scale + shift, 0.0), mask

        # ---- block 1: C_in = 1 -> K1 VPU FMAs (shifted slice x w1 row); MXU skipped ----
        xv = x_ref[...]                                                       # (B, TXP, 1) f32
        w1v = w1_ref[...]                                                     # (K1, C1)   f32
        z1 = jnp.zeros((B, T1P, C1), f32)
        for j in range(K1):                                                   # static unroll (8)
            z1 = z1 + xv[:, j:j + T1P, :] * w1v[j:j + 1, :].reshape(1, 1, C1)
        h1, _ = bn_relu(z1, gb1_ref, T1)
        h1 = h1.astype(jnp.bfloat16)                                          # (B, T1P, C1)

        # ---- block 2: VMEM im2col (depth K2*C1) -> one flat bf16 MXU matmul, f32 acc ----
        p2 = jnp.concatenate([h1[:, j:j + T2P, :] for j in range(K2)], axis=-1)
        z2 = jnp.dot(p2.reshape(B * T2P, K2 * C1), w2_ref[...],
                     preferred_element_type=f32).reshape(B, T2P, C2)
        h2, _ = bn_relu(z2, gb2_ref, T2)
        h2 = h2.astype(jnp.bfloat16)                                          # (B, T2P, C2)

        # ---- block 3: VMEM im2col (depth K3*C2) -> one flat bf16 MXU matmul, f32 acc ----
        p3 = jnp.concatenate([h2[:, j:j + T3P, :] for j in range(K3)], axis=-1)
        z3 = jnp.dot(p3.reshape(B * T3P, K3 * C2), w3_ref[...],
                     preferred_element_type=f32).reshape(B, T3P, C3)
        h3, mask3 = bn_relu(z3, gb3_ref, T3)                                  # (B, T3P, C3) f32

        # ---- fused global average pool over the valid time rows (lane-dense output) ----
        o_ref[...] = (jnp.sum(h3 * mask3, axis=1) * (1.0 / float(T3))).astype(o_ref.dtype)

    pooled = pl.pallas_call(
        kernel,
        out_shape=jax.ShapeDtypeStruct((B, C3), jnp.float32),
        grid=(1,),
        in_specs=[
            pl.BlockSpec((B, TXP, 1), lambda i: (0, 0, 0)),
            pl.BlockSpec((K1, C1), lambda i: (0, 0)),
            pl.BlockSpec((2, C1), lambda i: (0, 0)),
            pl.BlockSpec((K2 * C1, C2), lambda i: (0, 0)),
            pl.BlockSpec((2, C2), lambda i: (0, 0)),
            pl.BlockSpec((K3 * C2, C3), lambda i: (0, 0)),
            pl.BlockSpec((2, C3), lambda i: (0, 0)),
        ],
        out_specs=pl.BlockSpec((B, C3), lambda i: (0, 0)),
        compiler_params=pltpu.CompilerParams(
            dimension_semantics=("arbitrary",),
        ),
    )(xt, w1m, gb1, w2f, gb2, w3f, gb3)

    return pooled.reshape(B, C3, 1)   # PyTorch AvgPool1d output convention: (B, C, 1)


# ---------------------------------------------------------------------------
# Parameter init (matches the PyTorch module's parameter shapes)
# ---------------------------------------------------------------------------
def init_params(key, channels, kernels):
    params = []
    for cin, cout, k in zip(channels[:-1], channels[1:], kernels):
        key, k1, k2, k3, k4 = jax.random.split(key, 5)
        bound = 1.0 / float((cin * k) ** 0.5)
        w = jax.random.uniform(k1, (cout, cin, k), jnp.float32, -bound, bound)
        b = jax.random.uniform(k2, (cout,), jnp.float32, -bound, bound)
        # perturb BN affine params so the gamma/beta path is actually exercised
        gamma = 1.0 + 0.1 * jax.random.normal(k3, (cout,), jnp.float32)
        beta = 0.1 * jax.random.normal(k4, (cout,), jnp.float32)
        params.append((w, b, gamma, beta))
    return params


# ---------------------------------------------------------------------------
# Pure-JAX f32 reference (includes the conv bias; verification only)
# ---------------------------------------------------------------------------
def reference_forward(x, params, kernels):
    h = x
    for (w, b, gamma, beta), _k in zip(params, kernels):
        z = lax.conv_general_dilated(
            h, w, (1,), "VALID",
            dimension_numbers=("NCH", "OIH", "NCH"),
            precision=lax.Precision.HIGHEST,
        ) + b[None, :, None]
        mean = jnp.mean(z, axis=(0, 2), keepdims=True)
        var = jnp.mean((z - mean) ** 2, axis=(0, 2), keepdims=True)   # biased, like torch BN
        zn = (z - mean) / jnp.sqrt(var + EPS)
        h = jnp.maximum(zn * gamma[None, :, None] + beta[None, :, None], 0.0)
    return jnp.mean(h, axis=2, keepdims=True)


if __name__ == "__main__":
    B, T = 2, 32                        # output length = T - sum(K) + 3 = 19
    channels = [1, 128, 256, 128]       # module defaults
    key = jax.random.PRNGKey(0)
    key, xk = jax.random.split(key)
    x = jax.random.normal(xk, (B, channels[0], T), jnp.float32)
    params = init_params(key, channels, KERNEL_SIZE)

    fwd = jax.jit(lambda xx: block_fcn_forward(xx, params))
    out = jax.block_until_ready(fwd(x))

    ref = reference_forward(x, params, KERNEL_SIZE)
    assert out.shape == (B, channels[-1], 1), out.shape
    assert bool(jnp.isfinite(out).all())
    err = float(jnp.max(jnp.abs(out - ref)))
    # bf16 MXU inputs for layers 2/3 with f32 accumulation vs. an f32-HIGHEST
    # reference (layer 1 is full f32 on the VPU).
    assert err < 3e-2, err
    print("KERNEL_OK")
</pallas_src>

<mosaic_0001>
module attributes {stable_mosaic.version = 11 : i64} {
  func.func @kernel(%arg0: i32, %arg1: memref<2x56x1xf32, #tpu.memory_space<vmem>>, %arg2: memref<8x128xf32, #tpu.memory_space<vmem>>, %arg3: memref<2x128xf32, #tpu.memory_space<vmem>>, %arg4: memref<640x256xbf16, #tpu.memory_space<vmem>>, %arg5: memref<2x256xf32, #tpu.memory_space<vmem>>, %arg6: memref<768x128xbf16, #tpu.memory_space<vmem>>, %arg7: memref<2x128xf32, #tpu.memory_space<vmem>>, %arg8: memref<2x128xf32, #tpu.memory_space<vmem>>) attributes {dimension_semantics = [#tpu.dimension_semantics<arbitrary>], iteration_bounds = array<i64: 1>, scalar_prefetch = 0 : i64, scratch_operands = 0 : i64, tpu.core_type = #tpu.core_type<tc>, window_params = [{pipeline_mode = #tpu.pipeline_mode<synchronous>, transform_indices = @transform_0, window_bounds = array<i64: 2, 56, 1>}, {pipeline_mode = #tpu.pipeline_mode<synchronous>, transform_indices = @transform_1, window_bounds = array<i64: 8, 128>}, {pipeline_mode = #tpu.pipeline_mode<synchronous>, transform_indices = @transform_2, window_bounds = array<i64: 2, 128>}, {pipeline_mode = #tpu.pipeline_mode<synchronous>, transform_indices = @transform_3, window_bounds = array<i64: 640, 256>}, {pipeline_mode = #tpu.pipeline_mode<synchronous>, transform_indices = @transform_4, window_bounds = array<i64: 2, 256>}, {pipeline_mode = #tpu.pipeline_mode<synchronous>, transform_indices = @transform_5, window_bounds = array<i64: 768, 128>}, {pipeline_mode = #tpu.pipeline_mode<synchronous>, transform_indices = @transform_6, window_bounds = array<i64: 2, 128>}, {pipeline_mode = #tpu.pipeline_mode<synchronous>, transform_indices = @transform_7, window_bounds = array<i64: 2, 128>}]} {
    %c0 = arith.constant 0 : index
    %c0_0 = arith.constant 0 : index
    %c0_1 = arith.constant 0 : index
    %0 = vector.load %arg1[%c0, %c0_0, %c0_1] : memref<2x56x1xf32, #tpu.memory_space<vmem>>, vector<2x56x1xf32>
    %c0_2 = arith.constant 0 : index
    %c0_3 = arith.constant 0 : index
    %1 = vector.load %arg2[%c0_2, %c0_3] : memref<8x128xf32, #tpu.memory_space<vmem>>, vector<8x128xf32>
    %cst = arith.constant 0.000000e+00 : f32
    %2 = vector.broadcast %cst : f32 to vector<2x48x128xf32>
    %3 = vector.extract_strided_slice %0 {offsets = [0, 0, 0], sizes = [2, 48, 1], strides = [1, 1, 1]} : vector<2x56x1xf32> to vector<2x48x1xf32>
    %4 = vector.extract_strided_slice %1 {offsets = [0, 0], sizes = [1, 128], strides = [1, 1]} : vector<8x128xf32> to vector<1x128xf32>
    %5 = vector.shape_cast %4 : vector<1x128xf32> to vector<1x1x128xf32>
    %6 = vector.broadcast %3 : vector<2x48x1xf32> to vector<2x48x128xf32>
    %7 = vector.broadcast %5 : vector<1x1x128xf32> to vector<2x48x128xf32>
    %8 = arith.mulf %6, %7 : vector<2x48x128xf32>
    %9 = arith.addf %2, %8 : vector<2x48x128xf32>
    %10 = vector.extract_strided_slice %0 {offsets = [0, 1, 0], sizes = [2, 48, 1], strides = [1, 1, 1]} : vector<2x56x1xf32> to vector<2x48x1xf32>
    %11 = vector.extract_strided_slice %1 {offsets = [1, 0], sizes = [1, 128], strides = [1, 1]} : vector<8x128xf32> to vector<1x128xf32>
    %12 = vector.shape_cast %11 : vector<1x128xf32> to vector<1x1x128xf32>
    %13 = vector.broadcast %10 : vector<2x48x1xf32> to vector<2x48x128xf32>
    %14 = vector.broadcast %12 : vector<1x1x128xf32> to vector<2x48x128xf32>
    %15 = arith.mulf %13, %14 : vector<2x48x128xf32>
    %16 = arith.addf %9, %15 : vector<2x48x128xf32>
    %17 = vector.extract_strided_slice %0 {offsets = [0, 2, 0], sizes = [2, 48, 1], strides = [1, 1, 1]} : vector<2x56x1xf32> to vector<2x48x1xf32>
    %18 = vector.extract_strided_slice %1 {offsets = [2, 0], sizes = [1, 128], strides = [1, 1]} : vector<8x128xf32> to vector<1x128xf32>
    %19 = vector.shape_cast %18 : vector<1x128xf32> to vector<1x1x128xf32>
    %20 = vector.broadcast %17 : vector<2x48x1xf32> to vector<2x48x128xf32>
    %21 = vector.broadcast %19 : vector<1x1x128xf32> to vector<2x48x128xf32>
    %22 = arith.mulf %20, %21 : vector<2x48x128xf32>
    %23 = arith.addf %16, %22 : vector<2x48x128xf32>
    %24 = vector.extract_strided_slice %0 {offsets = [0, 3, 0], sizes = [2, 48, 1], strides = [1, 1, 1]} : vector<2x56x1xf32> to vector<2x48x1xf32>
    %25 = vector.extract_strided_slice %1 {offsets = [3, 0], sizes = [1, 128], strides = [1, 1]} : vector<8x128xf32> to vector<1x128xf32>
    %26 = vector.shape_cast %25 : vector<1x128xf32> to vector<1x1x128xf32>
    %27 = vector.broadcast %24 : vector<2x48x1xf32> to vector<2x48x128xf32>
    %28 = vector.broadcast %26 : vector<1x1x128xf32> to vector<2x48x128xf32>
    %29 = arith.mulf %27, %28 : vector<2x48x128xf32>
    %30 = arith.addf %23, %29 : vector<2x48x128xf32>
    %31 = vector.extract_strided_slice %0 {offsets = [0, 4, 0], sizes = [2, 48, 1], strides = [1, 1, 1]} : vector<2x56x1xf32> to vector<2x48x1xf32>
    %32 = vector.extract_strided_slice %1 {offsets = [4, 0], sizes = [1, 128], strides = [1, 1]} : vector<8x128xf32> to vector<1x128xf32>
    %33 = vector.shape_cast %32 : vector<1x128xf32> to vector<1x1x128xf32>
    %34 = vector.broadcast %31 : vector<2x48x1xf32> to vector<2x48x128xf32>
    %35 = vector.broadcast %33 : vector<1x1x128xf32> to vector<2x48x128xf32>
    %36 = arith.mulf %34, %35 : vector<2x48x128xf32>
    %37 = arith.addf %30, %36 : vector<2x48x128xf32>
    %38 = vector.extract_strided_slice %0 {offsets = [0, 5, 0], sizes = [2, 48, 1], strides = [1, 1, 1]} : vector<2x56x1xf32> to vector<2x48x1xf32>
    %39 = vector.extract_strided_slice %1 {offsets = [5, 0], sizes = [1, 128], strides = [1, 1]} : vector<8x128xf32> to vector<1x128xf32>
    %40 = vector.shape_cast %39 : vector<1x128xf32> to vector<1x1x128xf32>
    %41 = vector.broadcast %38 : vector<2x48x1xf32> to vector<2x48x128xf32>
    %42 = vector.broadcast %40 : vector<1x1x128xf32> to vector<2x48x128xf32>
    %43 = arith.mulf %41, %42 : vector<2x48x128xf32>
    %44 = arith.addf %37, %43 : vector<2x48x128xf32>
    %45 = vector.extract_strided_slice %0 {offsets = [0, 6, 0], sizes = [2, 48, 1], strides = [1, 1, 1]} : vector<2x56x1xf32> to vector<2x48x1xf32>
    %46 = vector.extract_strided_slice %1 {offsets = [6, 0], sizes = [1, 128], strides = [1, 1]} : vector<8x128xf32> to vector<1x128xf32>
    %47 = vector.shape_cast %46 : vector<1x128xf32> to vector<1x1x128xf32>
    %48 = vector.broadcast %45 : vector<2x48x1xf32> to vector<2x48x128xf32>
    %49 = vector.broadcast %47 : vector<1x1x128xf32> to vector<2x48x128xf32>
    %50 = arith.mulf %48, %49 : vector<2x48x128xf32>
    %51 = arith.addf %44, %50 : vector<2x48x128xf32>
    %52 = vector.extract_strided_slice %0 {offsets = [0, 7, 0], sizes = [2, 48, 1], strides = [1, 1, 1]} : vector<2x56x1xf32> to vector<2x48x1xf32>
    %53 = vector.extract_strided_slice %1 {offsets = [7, 0], sizes = [1, 128], strides = [1, 1]} : vector<8x128xf32> to vector<1x128xf32>
    %54 = vector.shape_cast %53 : vector<1x128xf32> to vector<1x1x128xf32>
    %55 = vector.broadcast %52 : vector<2x48x1xf32> to vector<2x48x128xf32>
    %56 = vector.broadcast %54 : vector<1x1x128xf32> to vector<2x48x128xf32>
    %57 = arith.mulf %55, %56 : vector<2x48x128xf32>
    %58 = arith.addf %51, %57 : vector<2x48x128xf32>
    %59 = tpu.iota {dimensions = array<i32: 1>} : vector<1x48x1xi32>
    %c25_i32 = arith.constant 25 : i32
    %60 = vector.broadcast %c25_i32 : i32 to vector<1x48x1xi32>
    %61 = arith.cmpi slt, %59, %60 : vector<1x48x1xi32>
    %62 = arith.extui %61 : vector<1x48x1xi1> to vector<1x48x1xi32>
    %63 = arith.sitofp %62 : vector<1x48x1xi32> to vector<1x48x1xf32>
    %64 = vector.broadcast %63 : vector<1x48x1xf32> to vector<2x48x128xf32>
    %65 = arith.mulf %58, %64 : vector<2x48x128xf32>
    %cst_4 = arith.constant dense<0.000000e+00> : vector<2x128xf32>
    %66 = vector.multi_reduction <add>, %65, %cst_4 [1] : vector<2x48x128xf32> to vector<2x128xf32>
    %67 = vector.shape_cast %66 : vector<2x128xf32> to vector<2x1x128xf32>
    %cst_5 = arith.constant dense<0.000000e+00> : vector<1x128xf32>
    %68 = vector.multi_reduction <add>, %67, %cst_5 [0] : vector<2x1x128xf32> to vector<1x128xf32>
    %69 = vector.shape_cast %68 : vector<1x128xf32> to vector<1x1x128xf32>
    %70 = arith.mulf %65, %58 : vector<2x48x128xf32>
    %cst_6 = arith.constant dense<0.000000e+00> : vector<2x128xf32>
    %71 = vector.multi_reduction <add>, %70, %cst_6 [1] : vector<2x48x128xf32> to vector<2x128xf32>
    %72 = vector.shape_cast %71 : vector<2x128xf32> to vector<2x1x128xf32>
    %cst_7 = arith.constant dense<0.000000e+00> : vector<1x128xf32>
    %73 = vector.multi_reduction <add>, %72, %cst_7 [0] : vector<2x1x128xf32> to vector<1x128xf32>
    %74 = vector.shape_cast %73 : vector<1x128xf32> to vector<1x1x128xf32>
    %cst_8 = arith.constant 2.000000e-02 : f32
    %75 = vector.broadcast %cst_8 : f32 to vector<1x1x128xf32>
    %76 = arith.mulf %69, %75 : vector<1x1x128xf32>
    %cst_9 = arith.constant 2.000000e-02 : f32
    %77 = vector.broadcast %cst_9 : f32 to vector<1x1x128xf32>
    %78 = arith.mulf %74, %77 : vector<1x1x128xf32>
    %79 = arith.mulf %76, %76 : vector<1x1x128xf32>
    %80 = arith.subf %78, %79 : vector<1x1x128xf32>
    %cst_10 = arith.constant 0.000000e+00 : f32
    %81 = vector.broadcast %cst_10 : f32 to vector<1x1x128xf32>
    %82 = arith.maximumf %80, %81 : vector<1x1x128xf32>
    %c0_11 = arith.constant 0 : index
    %c0_12 = arith.constant 0 : index
    %83 = vector.load %arg3[%c0_11, %c0_12] : memref<2x128xf32, #tpu.memory_space<vmem>>, vector<1x128xf32>
    %84 = vector.shape_cast %83 : vector<1x128xf32> to vector<1x1x128xf32>
    %c1 = arith.constant 1 : index
    %c0_13 = arith.constant 0 : index
    %85 = vector.load %arg3[%c1, %c0_13] : memref<2x128xf32, #tpu.memory_space<vmem>>, vector<1x128xf32>
    %86 = vector.shape_cast %85 : vector<1x128xf32> to vector<1x1x128xf32>
    %cst_14 = arith.constant 1.000000e-03 : f32
    %87 = vector.broadcast %cst_14 : f32 to vector<1x1x128xf32>
    %88 = arith.addf %82, %87 : vector<1x1x128xf32>
    %89 = math.rsqrt %88 : vector<1x1x128xf32>
    %90 = arith.mulf %84, %89 : vector<1x1x128xf32>
    %91 = arith.mulf %76, %90 : vector<1x1x128xf32>
    %92 = arith.subf %86, %91 : vector<1x1x128xf32>
    %93 = vector.broadcast %90 : vector<1x1x128xf32> to vector<2x48x128xf32>
    %94 = arith.mulf %58, %93 : vector<2x48x128xf32>
    %95 = vector.broadcast %92 : vector<1x1x128xf32> to vector<2x48x128xf32>
    %96 = arith.addf %94, %95 : vector<2x48x128xf32>
    %cst_15 = arith.constant 0.000000e+00 : f32
    %97 = vector.broadcast %cst_15 : f32 to vector<2x48x128xf32>
    %98 = arith.maximumf %96, %97 : vector<2x48x128xf32>
    %99 = arith.truncf %98 : vector<2x48x128xf32> to vector<2x48x128xbf16>
    %100 = vector.extract_strided_slice %99 {offsets = [0, 0, 0], sizes = [2, 32, 128], strides = [1, 1, 1]} : vector<2x48x128xbf16> to vector<2x32x128xbf16>
    %101 = vector.extract_strided_slice %99 {offsets = [0, 1, 0], sizes = [2, 32, 128], strides = [1, 1, 1]} : vector<2x48x128xbf16> to vector<2x32x128xbf16>
    %102 = vector.extract_strided_slice %99 {offsets = [0, 2, 0], sizes = [2, 32, 128], strides = [1, 1, 1]} : vector<2x48x128xbf16> to vector<2x32x128xbf16>
    %103 = vector.extract_strided_slice %99 {offsets = [0, 3, 0], sizes = [2, 32, 128], strides = [1, 1, 1]} : vector<2x48x128xbf16> to vector<2x32x128xbf16>
    %104 = vector.extract_strided_slice %99 {offsets = [0, 4, 0], sizes = [2, 32, 128], strides = [1, 1, 1]} : vector<2x48x128xbf16> to vector<2x32x128xbf16>
    %105 = tpu.concatenate %100, %101, %102, %103, %104 in 2 : vector<2x32x128xbf16>, vector<2x32x128xbf16>, vector<2x32x128xbf16>, vector<2x32x128xbf16>, vector<2x32x128xbf16> -> vector<2x32x640xbf16>
    %106 = vector.shape_cast %105 : vector<2x32x640xbf16> to vector<64x640xbf16>
    %c0_16 = arith.constant 0 : index
    %c0_17 = arith.constant 0 : index
    %107 = vector.load %arg4[%c0_16, %c0_17] : memref<640x256xbf16, #tpu.memory_space<vmem>>, vector<640x256xbf16>
    %cst_18 = arith.constant dense<0.000000e+00> : vector<64x256xf32>
    %108 = tpu.matmul %106, %107, %cst_18 {dimension_numbers = #tpu.dot_dimension_numbers<[1], [0], [0], [1], [0, 0, 1, 1], [], []>} : vector<64x640xbf16>, vector<640x256xbf16>, vector<64x256xf32> -> vector<64x256xf32>
    %109 = vector.shape_cast %108 : vector<64x256xf32> to vector<2x32x256xf32>
    %110 = tpu.iota {dimensions = array<i32: 1>} : vector<1x32x1xi32>
    %c21_i32 = arith.constant 21 : i32
    %111 = vector.broadcast %c21_i32 : i32 to vector<1x32x1xi32>
    %112 = arith.cmpi slt, %110, %111 : vector<1x32x1xi32>
    %113 = arith.extui %112 : vector<1x32x1xi1> to vector<1x32x1xi32>
    %114 = arith.sitofp %113 : vector<1x32x1xi32> to vector<1x32x1xf32>
    %115 = vector.broadcast %114 : vector<1x32x1xf32> to vector<2x32x256xf32>
    %116 = arith.mulf %109, %115 : vector<2x32x256xf32>
    %cst_19 = arith.constant dense<0.000000e+00> : vector<2x256xf32>
    %117 = vector.multi_reduction <add>, %116, %cst_19 [1] : vector<2x32x256xf32> to vector<2x256xf32>
    %118 = vector.shape_cast %117 : vector<2x256xf32> to vector<2x1x256xf32>
    %cst_20 = arith.constant dense<0.000000e+00> : vector<1x256xf32>
    %119 = vector.multi_reduction <add>, %118, %cst_20 [0] : vector<2x1x256xf32> to vector<1x256xf32>
    %120 = vector.shape_cast %119 : vector<1x256xf32> to vector<1x1x256xf32>
    %121 = arith.mulf %116, %109 : vector<2x32x256xf32>
    %cst_21 = arith.constant dense<0.000000e+00> : vector<2x256xf32>
    %122 = vector.multi_reduction <add>, %121, %cst_21 [1] : vector<2x32x256xf32> to vector<2x256xf32>
    %123 = vector.shape_cast %122 : vector<2x256xf32> to vector<2x1x256xf32>
    %cst_22 = arith.constant dense<0.000000e+00> : vector<1x256xf32>
    %124 = vector.multi_reduction <add>, %123, %cst_22 [0] : vector<2x1x256xf32> to vector<1x256xf32>
    %125 = vector.shape_cast %124 : vector<1x256xf32> to vector<1x1x256xf32>
    %cst_23 = arith.constant 0.0238095243 : f32
    %126 = vector.broadcast %cst_23 : f32 to vector<1x1x256xf32>
    %127 = arith.mulf %120, %126 : vector<1x1x256xf32>
    %cst_24 = arith.constant 0.0238095243 : f32
    %128 = vector.broadcast %cst_24 : f32 to vector<1x1x256xf32>
    %129 = arith.mulf %125, %128 : vector<1x1x256xf32>
    %130 = arith.mulf %127, %127 : vector<1x1x256xf32>
    %131 = arith.subf %129, %130 : vector<1x1x256xf32>
    %cst_25 = arith.constant 0.000000e+00 : f32
    %132 = vector.broadcast %cst_25 : f32 to vector<1x1x256xf32>
    %133 = arith.maximumf %131, %132 : vector<1x1x256xf32>
    %c0_26 = arith.constant 0 : index
    %c0_27 = arith.constant 0 : index
    %134 = vector.load %arg5[%c0_26, %c0_27] : memref<2x256xf32, #tpu.memory_space<vmem>>, vector<1x256xf32>
    %135 = vector.shape_cast %134 : vector<1x256xf32> to vector<1x1x256xf32>
    %c1_28 = arith.constant 1 : index
    %c0_29 = arith.constant 0 : index
    %136 = vector.load %arg5[%c1_28, %c0_29] : memref<2x256xf32, #tpu.memory_space<vmem>>, vector<1x256xf32>
    %137 = vector.shape_cast %136 : vector<1x256xf32> to vector<1x1x256xf32>
    %cst_30 = arith.constant 1.000000e-03 : f32
    %138 = vector.broadcast %cst_30 : f32 to vector<1x1x256xf32>
    %139 = arith.addf %133, %138 : vector<1x1x256xf32>
    %140 = math.rsqrt %139 : vector<1x1x256xf32>
    %141 = arith.mulf %135, %140 : vector<1x1x256xf32>
    %142 = arith.mulf %127, %141 : vector<1x1x256xf32>
    %143 = arith.subf %137, %142 : vector<1x1x256xf32>
    %144 = vector.broadcast %141 : vector<1x1x256xf32> to vector<2x32x256xf32>
    %145 = arith.mulf %109, %144 : vector<2x32x256xf32>
    %146 = vector.broadcast %143 : vector<1x1x256xf32> to vector<2x32x256xf32>
    %147 = arith.addf %145, %146 : vector<2x32x256xf32>
    %cst_31 = arith.constant 0.000000e+00 : f32
    %148 = vector.broadcast %cst_31 : f32 to vector<2x32x256xf32>
    %149 = arith.maximumf %147, %148 : vector<2x32x256xf32>
    %150 = arith.truncf %149 : vector<2x32x256xf32> to vector<2x32x256xbf16>
    %151 = vector.extract_strided_slice %150 {offsets = [0, 0, 0], sizes = [2, 24, 256], strides = [1, 1, 1]} : vector<2x32x256xbf16> to vector<2x24x256xbf16>
    %152 = vector.extract_strided_slice %150 {offsets = [0, 1, 0], sizes = [2, 24, 256], strides = [1, 1, 1]} : vector<2x32x256xbf16> to vector<2x24x256xbf16>
    %153 = vector.extract_strided_slice %150 {offsets = [0, 2, 0], sizes = [2, 24, 256], strides = [1, 1, 1]} : vector<2x32x256xbf16> to vector<2x24x256xbf16>
    %154 = tpu.concatenate %151, %152, %153 in 2 : vector<2x24x256xbf16>, vector<2x24x256xbf16>, vector<2x24x256xbf16> -> vector<2x24x768xbf16>
    %155 = vector.shape_cast %154 : vector<2x24x768xbf16> to vector<48x768xbf16>
    %c0_32 = arith.constant 0 : index
    %c0_33 = arith.constant 0 : index
    %156 = vector.load %arg6[%c0_32, %c0_33] : memref<768x128xbf16, #tpu.memory_space<vmem>>, vector<768x128xbf16>
    %cst_34 = arith.constant dense<0.000000e+00> : vector<48x128xf32>
    %157 = tpu.matmul %155, %156, %cst_34 {dimension_numbers = #tpu.dot_dimension_numbers<[1], [0], [0], [1], [0, 0, 1, 1], [], []>} : vector<48x768xbf16>, vector<768x128xbf16>, vector<48x128xf32> -> vector<48x128xf32>
    %158 = vector.shape_cast %157 : vector<48x128xf32> to vector<2x24x128xf32>
    %159 = tpu.iota {dimensions = array<i32: 1>} : vector<1x24x1xi32>
    %c19_i32 = arith.constant 19 : i32
    %160 = vector.broadcast %c19_i32 : i32 to vector<1x24x1xi32>
    %161 = arith.cmpi slt, %159, %160 : vector<1x24x1xi32>
    %162 = arith.extui %161 : vector<1x24x1xi1> to vector<1x24x1xi32>
    %163 = arith.sitofp %162 : vector<1x24x1xi32> to vector<1x24x1xf32>
    %164 = vector.broadcast %163 : vector<1x24x1xf32> to vector<2x24x128xf32>
    %165 = arith.mulf %158, %164 : vector<2x24x128xf32>
    %cst_35 = arith.constant dense<0.000000e+00> : vector<2x128xf32>
    %166 = vector.multi_reduction <add>, %165, %cst_35 [1] : vector<2x24x128xf32> to vector<2x128xf32>
    %167 = vector.shape_cast %166 : vector<2x128xf32> to vector<2x1x128xf32>
    %cst_36 = arith.constant dense<0.000000e+00> : vector<1x128xf32>
    %168 = vector.multi_reduction <add>, %167, %cst_36 [0] : vector<2x1x128xf32> to vector<1x128xf32>
    %169 = vector.shape_cast %168 : vector<1x128xf32> to vector<1x1x128xf32>
    %170 = arith.mulf %165, %158 : vector<2x24x128xf32>
    %cst_37 = arith.constant dense<0.000000e+00> : vector<2x128xf32>
    %171 = vector.multi_reduction <add>, %170, %cst_37 [1] : vector<2x24x128xf32> to vector<2x128xf32>
    %172 = vector.shape_cast %171 : vector<2x128xf32> to vector<2x1x128xf32>
    %cst_38 = arith.constant dense<0.000000e+00> : vector<1x128xf32>
    %173 = vector.multi_reduction <add>, %172, %cst_38 [0] : vector<2x1x128xf32> to vector<1x128xf32>
    %174 = vector.shape_cast %173 : vector<1x128xf32> to vector<1x1x128xf32>
    %cst_39 = arith.constant 0.0263157897 : f32
    %175 = vector.broadcast %cst_39 : f32 to vector<1x1x128xf32>
    %176 = arith.mulf %169, %175 : vector<1x1x128xf32>
    %cst_40 = arith.constant 0.0263157897 : f32
    %177 = vector.broadcast %cst_40 : f32 to vector<1x1x128xf32>
    %178 = arith.mulf %174, %177 : vector<1x1x128xf32>
    %179 = arith.mulf %176, %176 : vector<1x1x128xf32>
    %180 = arith.subf %178, %179 : vector<1x1x128xf32>
    %cst_41 = arith.constant 0.000000e+00 : f32
    %181 = vector.broadcast %cst_41 : f32 to vector<1x1x128xf32>
    %182 = arith.maximumf %180, %181 : vector<1x1x128xf32>
    %c0_42 = arith.constant 0 : index
    %c0_43 = arith.constant 0 : index
    %183 = vector.load %arg7[%c0_42, %c0_43] : memref<2x128xf32, #tpu.memory_space<vmem>>, vector<1x128xf32>
    %184 = vector.shape_cast %183 : vector<1x128xf32> to vector<1x1x128xf32>
    %c1_44 = arith.constant 1 : index
    %c0_45 = arith.constant 0 : index
    %185 = vector.load %arg7[%c1_44, %c0_45] : memref<2x128xf32, #tpu.memory_space<vmem>>, vector<1x128xf32>
    %186 = vector.shape_cast %185 : vector<1x128xf32> to vector<1x1x128xf32>
    %cst_46 = arith.constant 1.000000e-03 : f32
    %187 = vector.broadcast %cst_46 : f32 to vector<1x1x128xf32>
    %188 = arith.addf %182, %187 : vector<1x1x128xf32>
    %189 = math.rsqrt %188 : vector<1x1x128xf32>
    %190 = arith.mulf %184, %189 : vector<1x1x128xf32>
    %191 = arith.mulf %176, %190 : vector<1x1x128xf32>
    %192 = arith.subf %186, %191 : vector<1x1x128xf32>
    %193 = vector.broadcast %190 : vector<1x1x128xf32> to vector<2x24x128xf32>
    %194 = arith.mulf %158, %193 : vector<2x24x128xf32>
    %195 = vector.broadcast %192 : vector<1x1x128xf32> to vector<2x24x128xf32>
    %196 = arith.addf %194, %195 : vector<2x24x128xf32>
    %cst_47 = arith.constant 0.000000e+00 : f32
    %197 = vector.broadcast %cst_47 : f32 to vector<2x24x128xf32>
    %198 = arith.maximumf %196, %197 : vector<2x24x128xf32>
    %199 = vector.broadcast %163 : vector<1x24x1xf32> to vector<2x24x128xf32>
    %200 = arith.mulf %198, %199 : vector<2x24x128xf32>
    %cst_48 = arith.constant dense<0.000000e+00> : vector<2x128xf32>
    %201 = vector.multi_reduction <add>, %200, %cst_48 [1] : vector<2x24x128xf32> to vector<2x128xf32>
    %cst_49 = arith.constant 0.0526315793 : f32
    %202 = vector.broadcast %cst_49 : f32 to vector<2x128xf32>
    %203 = arith.mulf %201, %202 : vector<2x128xf32>
    %c0_50 = arith.constant 0 : index
    %c0_51 = arith.constant 0 : index
    %204 = vector.load %arg8[%c0_50, %c0_51] : memref<2x128xf32, #tpu.memory_space<vmem>>, vector<2x128xf32>
    tpu.vector_store %arg8[%c0_50, %c0_51], %203 {strides = array<i32>} : memref<2x128xf32, #tpu.memory_space<vmem>>, vector<2x128xf32>,
    return
  }
  func.func @transform_0(%arg0: i32) -> (i32, i32, i32) {
    %c0_i32 = arith.constant 0 : i32
    %c0_i32_0 = arith.constant 0 : i32
    %c0_i32_1 = arith.constant 0 : i32
    %c0_i32_2 = arith.constant 0 : i32
    return %c0_i32, %c0_i32_0, %c0_i32_1 : i32, i32, i32
  }
  func.func @transform_1(%arg0: i32) -> (i32, i32) {
    %c0_i32 = arith.constant 0 : i32
    %c0_i32_0 = arith.constant 0 : i32
    %c0_i32_1 = arith.constant 0 : i32
    return %c0_i32, %c0_i32_0 : i32, i32
  }
  func.func @transform_2(%arg0: i32) -> (i32, i32) {
    %c0_i32 = arith.constant 0 : i32
    %c0_i32_0 = arith.constant 0 : i32
    %c0_i32_1 = arith.constant 0 : i32
    return %c0_i32, %c0_i32_0 : i32, i32
  }
  func.func @transform_3(%arg0: i32) -> (i32, i32) {
    %c0_i32 = arith.constant 0 : i32
    %c0_i32_0 = arith.constant 0 : i32
    %c0_i32_1 = arith.constant 0 : i32
    return %c0_i32, %c0_i32_0 : i32, i32
  }
  func.func @transform_4(%arg0: i32) -> (i32, i32) {
    %c0_i32 = arith.constant 0 : i32
    %c0_i32_0 = arith.constant 0 : i32
    %c0_i32_1 = arith.constant 0 : i32
    return %c0_i32, %c0_i32_0 : i32, i32
  }
  func.func @transform_5(%arg0: i32) -> (i32, i32) {
    %c0_i32 = arith.constant 0 : i32
    %c0_i32_0 = arith.constant 0 : i32
    %c0_i32_1 = arith.constant 0 : i32
    return %c0_i32, %c0_i32_0 : i32, i32
  }
  func.func @transform_6(%arg0: i32) -> (i32, i32) {
    %c0_i32 = arith.constant 0 : i32
    %c0_i32_0 = arith.constant 0 : i32
    %c0_i32_1 = arith.constant 0 : i32
    return %c0_i32, %c0_i32_0 : i32, i32
  }
  func.func @transform_7(%arg0: i32) -> (i32, i32) {
    %c0_i32 = arith.constant 0 : i32
    %c0_i32_0 = arith.constant 0 : i32
    %c0_i32_1 = arith.constant 0 : i32
    return %c0_i32, %c0_i32_0 : i32, i32
  }
}

</mosaic_0001>

<bundles_post_ra>
// kernel: _lambda_.1
= control target key start
LH: loop header
LB: loop body
LE: loop exit
PB: predicated region body
PF: predicated region fallthrough
CT: control target
= control target key end

     0   :  { %12 = vsyncpa [#allocation3], 0  ;;  %s4516_s0 = inlined_call_operand.vmem [shape: f32[2,56,1], index: 0, kind: input, shape index: {}]   ;;  %s4517_s1 = inlined_call_operand.vmem [shape: f32[8,128], index: 1, kind: input, shape index: {}]   ;;  %s4518_s2 = inlined_call_operand.vmem [shape: f32[2,128], index: 2, kind: input, shape index: {}]   ;;  %s4519_s3 = inlined_call_operand.hbm [shape: bf16[640,256], index: 3, kind: input, shape index: {}]   ;;  %s4520_s4 = inlined_call_operand.vmem [shape: f32[2,256], index: 4, kind: input, shape index: {}]   ;;  %s4521_s5 = inlined_call_operand.hbm [shape: bf16[768,128], index: 5, kind: input, shape index: {}]   ;;  %s4522_s6 = inlined_call_operand.vmem [shape: f32[2,128], index: 6, kind: input, shape index: {}]   ;;  %s4523_s7 = inlined_call_operand.hbm [shape: f32[2,128], index: 7, kind: output, shape index: {}]  }
   0x1   :  { %13 = vsyncpa [#allocation6], 0 }
   0x2   :  { %14 = vsyncpa [#allocation4], 0  ;;  %s3315_s24 = smov [#allocation2]  }
   0x3   :  { %s26_s25 = sshll.u32 %s3315_s24, 4  ;;  %s27_s25 = int_to_ptr.vmem [resolvable:$true] %s26_s25 }
   0x4   :  { %s3257_s26 = scalar_lea.vmem %s27_s25, 10240  ;;  %p3262_p1 = scmp.lt.s32.totalorder %s27_s25, %s27_s25 }
   0x5   :  { %p3258_p0 = scmp.ne.s32.totalorder %s27_s25, %s3257_s26  ;;  %p3263_p2 = scmp.lt.s32.totalorder %s3257_s26, %s3257_s26 }
   0x7   :  { %p3264_p3 = por %p3263_p2, %p3262_p1 }
   0x9   :  { %p3265_p4 = pnand %p3264_p3, %p3258_p0 }
   0xb   :  { %3268 = shalt.err (!%p3265_p4)
}
   0xc   :  { %s3316_s27 = smov 128   ;;  %s3317_s28 = smov 8  }
   0xd   :  { %32 = dma.hbm_to_vmem [thread:$0]  %s4519_s3, 10240, %s27_s25, [#allocation3], %s3316_s27, %s3316_s27, %s3317_s28  }
   0xe   :  { %s3318_s8 = smov [#allocation5]  }
   0xf   :  { %s40_s9 = sshll.u32 %s3318_s8, 4  ;;  %s41_s9 = int_to_ptr.vmem [resolvable:$true] %s40_s9 }
  0x10   :  { %s3277_s10 = scalar_lea.vmem %s41_s9, 6144  ;;  %p3282_p6 = scmp.lt.s32.totalorder %s41_s9, %s41_s9 }
  0x11   :  { %p3278_p5 = scmp.ne.s32.totalorder %s41_s9, %s3277_s10  ;;  %p3283_p7 = scmp.lt.s32.totalorder %s3277_s10, %s3277_s10 }
  0x13   :  { %p3284_p8 = por %p3283_p7, %p3282_p6 }
  0x15   :  { %p3285_p9 = pnand %p3284_p8, %p3278_p5 }
  0x17   :  { %3288 = shalt.err (!%p3285_p9)
}
  0x18   :  { %s3319_s11 = smov 64   ;;  %s3320_s12 = smov 4  }
  0x19   :  { %46 = dma.hbm_to_vmem [thread:$0]  %s4521_s5, 6144, %s41_s9, [#allocation6], %s3319_s11, %s3319_s11, %s3320_s12  }
  0x1a   :  { %3309 = dma.done.wait [#allocation3], 10240  }
  0x1b   :  { %3310 = vsyncadd [#allocation3], 4294957056 }
  0x1c   :  { %3311 = dma.done.wait [#allocation6], 6144  }
  0x1d   :  { %3312 = vsyncadd [#allocation6], 4294961152  ;;  %v4526_v0 = vmov 0   ;;  %v58_v1 = vld [vmem:[%s4516_s0 + $0x10] sm:$0xff]  ;;  %v56_v2 = vld [vmem:[%s4516_s0] sm:$0xff]  ;;  %v131_v15 = vlaneseq  ;;  %vm201_vm1 = vcmask 1046528  }
  0x1e   :  { %3072 = vset.pattern.permute.xlu1 %v4526_v0  ;;  %3071 = vset.pattern.permute.xlu0 %v4526_v0  ;;  %v63_v3 = vld [vmem:[%s4516_s0 + $0x38] sm:$0xff]  ;;  %v57_v4 = vld [vmem:[%s4516_s0 + $0x8] sm:$0xff]  ;;  %v64_v6 = vld [vmem:[%s4516_s0 + $0x40] sm:$0xff]  ;;  %vm284_vm2 = vcmask 1045504   ;;  %vm367_vm3 = vcmask 1044480   ;;  %vm450_vm4 = vcmask 1043456  }
  0x1f   :  { %83 = vperm.xlu1 %3072, %v58_v1   ;;  %73 = vperm.xlu0 %3071, %v56_v2   ;;  %v65_v5 = vld [vmem:[%s4516_s0 + $0x48] sm:$0xff]  ;;  %v60_v7 = vld [vmem:[%s4516_s0 + $0x20] sm:$0xff]  ;;  %v59_v8 = vld [vmem:[%s4516_s0 + $0x18] sm:$0xff]  ;;  %v3415_v20 = vshrl.u32 %v131_v15, 7  ;;  %vm533_vm5 = vcmask 1042432   ;;  %vm616_vm6 = vcmask 1041408  }
  0x20   :  { %v67_v9 = vld [vmem:[%s4516_s0 + $0x58] sm:$0xff]  ;;  %v66_v10 = vld [vmem:[%s4516_s0 + $0x50] sm:$0xff]  ;;  %v68_v11 = vld [vmem:[%s4516_s0 + $0x60] sm:$0xff]  ;;  %vm699_vm7 = vcmask 1040384   ;;  %vm907_vm8 = vsmask.f32 7424 }
  0x21   :  { %v61_v12 = vld [vmem:[%s4516_s0 + $0x28] sm:$0xff]  ;;  %v62_v14 = vld [vmem:[%s4516_s0 + $0x30] sm:$0xff]  ;;  %4556 = vst [vmem:[#allocation11_spill] sm:$0xff] %v3415_v20  ;;  %v3418_v25 = vsub.s32 1, %v3415_v20  ;;  %v254_v26 = vsub.s32 2, %v3415_v20  ;;  %v337_v27 = vsub.s32 3, %v3415_v20 }
  0x22   :  { %v69_v13 = vld [vmem:[%s4516_s0 + $0x68] sm:$0xff]  ;;  %v3073_v16 = vld [vmem:[#allocation2 + $0x74] ss:$8 sps:$4 sm:$0xff]   ;;  %v3075_v18 = vld [vmem:[#allocation2 + $0x70] ss:$8 sps:$4 sm:$0xff]   ;;  %v420_v28 = vsub.s32 4, %v3415_v20 }
  0x23   :  { %103 = vperm.xlu1 %3072, %v63_v3   ;;  %78 = vperm.xlu0 %3071, %v57_v4   ;;  %v3076_v17 = vld [vmem:[#allocation2 + $0x174] ss:$8 sps:$4 sm:$0xff]   ;;  %v3078_v19 = vld [vmem:[#allocation2 + $0x170] ss:$8 sps:$4 sm:$0xff]   ;;  %v3079_v21 = vld [vmem:[#allocation2 + $0x64] ss:$8 sps:$4 sm:$0xff]  }
  0x24   :  { %1499 = vmatprep.subr.bf16.mxu0 %v3073_v16  ;;  %1572 = vmatprep.subr.bf16.mxu1 %v3076_v17  ;;  %v3082_v22 = vld [vmem:[#allocation2 + $0x164] ss:$8 sps:$4 sm:$0xff]   ;;  %v3081_v23 = vld [vmem:[#allocation2 + $0x60] ss:$8 sps:$4 sm:$0xff]   ;;  %4557 = vst [vmem:[#allocation12_spill] sm:$0xff] %v3418_v25  ;;  %v503_v32 = vsub.s32 5, %v3415_v20 }
  0x25   :  { %1500 = vmatpush1.bf16.msra.mxu0 %v3075_v18  ;;  %1573 = vmatpush1.bf16.msra.mxu1 %v3078_v19  ;;  %v3084_v24 = vld [vmem:[#allocation2 + $0x160] ss:$8 sps:$4 sm:$0xff]   ;;  %v3085_v29 = vld [vmem:[#allocation2 + $0x54] ss:$8 sps:$4 sm:$0xff]   ;;  %v3087_v33 = vld [vmem:[#allocation2 + $0x50] ss:$8 sps:$4 sm:$0xff]  }
  0x26   :  { %1501 = vmatprep.subr.bf16.mxu0 %v3079_v21  ;;  %1574 = vmatprep.subr.bf16.mxu1 %v3082_v22  ;;  %v3088_v30 = vld [vmem:[#allocation2 + $0x154] ss:$8 sps:$4 sm:$0xff]   ;;  %v70_v31 = vld [vmem:[%s4517_s1] sm:$0xff]  ;;  %v3090_v34 = vld [vmem:[#allocation2 + $0x150] ss:$8 sps:$4 sm:$0xff]   ;;  %v586_v35 = vsub.s32 6, %v3415_v20 }
  0x27   :  { %113 = vperm.xlu1 %3072, %v65_v5   ;;  %108 = vperm.xlu0 %3071, %v64_v6   ;;  %v669_v36 = vsub.s32 7, %v3415_v20  ;;  %v3430_v37 = vrot.slane %v70_v31, %v3418_v25  ;;  %v3432_v38 = vrot.slane %v70_v31, %v254_v26  ;;  %v754_v39 = vadd.s32 24, %v3415_v20  ;;  %v3091_v40 = vld [vmem:[#allocation2 + $0x44] ss:$8 sps:$4 sm:$0xff]   ;;  %v3093_v47 = vld [vmem:[#allocation2 + $0x40] ss:$8 sps:$4 sm:$0xff]  }
  0x28   :  { %v3094_v41 = vld [vmem:[#allocation2 + $0x144] ss:$8 sps:$4 sm:$0xff]   ;;  %v3436_v42 = vsub.s32 0, %v3415_v20  ;;  %v3438_v43 = vrot.slane %v70_v31, %v337_v27  ;;  %v3440_v44 = vrot.slane %v70_v31, %v420_v28  ;;  %v3442_v45 = vrot.slane %v70_v31, %v503_v32  ;;  %v3096_v48 = vld [vmem:[#allocation2 + $0x140] ss:$8 sps:$4 sm:$0xff]  }
  0x29   :  { %1502 = vmatpush1.bf16.msra.mxu0 %v3081_v23  ;;  %1575 = vmatpush1.bf16.msra.mxu1 %v3084_v24  ;;  %v3444_v49 = vrot.slane %v70_v31, %v586_v35  ;;  %v3446_v50 = vrot.slane %v70_v31, %v669_v36  ;;  %vm760_vm0 = vcmp.lt.s32.totalorder %v754_v39, 25  ;;  %v3097_v54 = vld [vmem:[#allocation2 + $0x34] ss:$8 sps:$4 sm:$0xff]   ;;  %v3099_v60 = vld [vmem:[#allocation2 + $0x30] ss:$8 sps:$4 sm:$0xff]   ;;  %v4524_v4 = vmov 0.0  }
  0x2a   :  { %1503 = vmatprep.subr.bf16.mxu0 %v3085_v29  ;;  %1576 = vmatprep.subr.bf16.mxu1 %v3088_v30  ;;  %v3100_v55 = vld [vmem:[#allocation2 + $0x134] ss:$8 sps:$4 sm:$0xff]   ;;  %v3455_v56 = vrot.slane %v70_v31, %v3436_v42  ;;  %v3102_v61 = vld [vmem:[#allocation2 + $0x130] ss:$8 sps:$4 sm:$0xff]   ;;  %v3481_v5 = vsel %vm760_vm0, 1.0, %v4524_v4  ;;  %vm2799_vm12 = vcmask 1041409  }
  0x2b   :  { %93 = vperm.xlu1 %3072, %v60_v7   ;;  %88 = vperm.xlu0 %3071, %v59_v8   ;;  %v3105_v17 = vld [vmem:[#allocation2 + $0x20] ss:$8 sps:$4 sm:$0xff]   ;;  %v3112_v35 = vld [vmem:[#allocation2 + $0x114] ss:$8 sps:$4 sm:$0xff]   ;;  %v3138_v36 = vld [vmem:[#allocation2 + $0x1d0] ss:$8 sps:$4 sm:$0xff]  }
  0x2c   :  { %v3108_v18 = vld [vmem:[#allocation2 + $0x120] ss:$8 sps:$4 sm:$0xff]   ;;  %vm973_vm9 = vsmask.f32 6400 }
  0x2d   :  { %1504 = vmatpush1.bf16.msra.mxu0 %v3087_v33  ;;  %1577 = vmatpush1.bf16.msra.mxu1 %v3090_v34  ;;  %v3109_v34 = vld [vmem:[#allocation2 + $0x14] ss:$8 sps:$4 sm:$0xff]   ;;  %v3117_v4 = vld [vmem:[#allocation2] ss:$8 sps:$4 sm:$0xff]  }
  0x2e   :  { %1505 = vmatprep.subr.bf16.mxu0 %v3091_v40  ;;  %1578 = vmatprep.subr.bf16.mxu1 %v3094_v41  ;;  %v3120_v0 = vld [vmem:[#allocation2 + $0x100] ss:$8 sps:$4 sm:$0xff]  }
  0x2f   :  { %123 = vperm.xlu1 %3072, %v67_v9   ;;  %118 = vperm.xlu0 %3071, %v66_v10  }
  0x31   :  { %1506 = vmatpush1.bf16.msra.mxu0 %v3093_v47  ;;  %1579 = vmatpush1.bf16.msra.mxu1 %v3096_v48  ;;  %v3114_v47 = vld [vmem:[#allocation2 + $0x110] ss:$8 sps:$4 sm:$0xff]  }
  0x32   :  { %1507 = vmatprep.subr.bf16.mxu0 %v3097_v54  ;;  %1580 = vmatprep.subr.bf16.mxu1 %v3100_v55 }
  0x33   :  { %128 = vperm.xlu1 %3072, %v68_v11   ;;  %98 = vperm.xlu0 %3071, %v61_v12   ;;  %v3103_v11 = vld [vmem:[#allocation2 + $0x24] ss:$8 sps:$4 sm:$0xff]  }
  0x34   :  { %v3106_v12 = vld [vmem:[#allocation2 + $0x124] ss:$8 sps:$4 sm:$0xff]  }
  0x35   :  { %1508 = vmatpush1.bf16.msra.mxu0 %v3099_v60  ;;  %1581 = vmatpush1.bf16.msra.mxu1 %v3102_v61 }
  0x36   :  { %1509 = vmatprep.subr.bf16.mxu0 %v3103_v11  ;;  %1582 = vmatprep.subr.bf16.mxu1 %v3106_v12 }
  0x37   :  { %166 = vperm.xlu1 %3072, %v69_v13   ;;  %161 = vperm.xlu0 %3071, %v62_v14  }
  0x39   :  { %1510 = vmatpush1.bf16.msra.mxu0 %v3105_v17  ;;  %1583 = vmatpush1.bf16.msra.mxu1 %v3108_v18 }
  0x3a   :  { %1511 = vmatprep.subr.bf16.mxu0 %v3109_v34  ;;  %1584 = vmatprep.subr.bf16.mxu1 %v3112_v35 }
  0x3d   :  { %1585 = vmatpush1.bf16.msra.mxu1 %v3114_v47 }
  0x9a   :  { %v84_v46 = vpop.permute.xlu1 %83  ;;  %v74_v51 = vpop.permute.xlu0 %73 }
  0x9b   :  { %v3449_v52 = vmul.f32 %v3430_v37, %v84_v46  ;;  %v3452_v53 = vmul.f32 %v3432_v38, %v84_v46  ;;  %v3458_v57 = vmul.f32 %v3438_v43, %v84_v46  ;;  %v3461_v58 = vmul.f32 %v3440_v44, %v84_v46 }
  0x9c   :  { %v3464_v59 = vmul.f32 %v3442_v45, %v84_v46  ;;  %v3467_v62 = vmul.f32 %v3444_v49, %v84_v46  ;;  %v3470_v63 = vmul.f32 %v3446_v50, %v84_v46  ;;  %v173_v1 = vmul.f32 %v3430_v37, %v74_v51 }
  0x9d   :  { %v3474_v2 = vmul.f32 %v3432_v38, %v74_v51  ;;  %v3477_v3 = vmul.f32 %v3438_v43, %v74_v51  ;;  %v4528_v6 = vrot.slane %v3449_v52, 1  ;;  %v4529_v7 = vrot.slane %v3452_v53, 2 }
  0x9e   :  { %v3486_v8 = vmul.f32 %v3440_v44, %v74_v51  ;;  %v3489_v9 = vmul.f32 %v3442_v45, %v74_v51  ;;  %v3491_v10 = vpop.permute.xlu0 %78  ;;  %v3494_v13 = vmul.f32 %v3455_v56, %v84_v46  ;;  %v4531_v14 = vrot.slane %v3458_v57, 3  ;;  %v104_v24 = vpop.permute.xlu1 %103  ;;  %v3111_v46 = vld [vmem:[#allocation2 + $0x10] ss:$8 sps:$4 sm:$0xff]  }
  0x9f   :  { %v4530_v15 = vrot.slane %v3461_v58, 4  ;;  %v3499_v16 = vmul.f32 %v3444_v49, %v74_v51  ;;  %v4532_v19 = vrot.slane %v3464_v59, 5  ;;  %v202_v23 = vrot.slane %v173_v1, 1  ;;  %1512 = vmatpush1.bf16.msra.mxu0 %v3111_v46 }
  0xa0   :  { %v285_v26 = vrot.slane %v3474_v2, 2  ;;  %v368_v27 = vrot.slane %v3477_v3, 3  ;;  %v174_v28 = vmul.f32 %v3430_v37, %v3491_v10  ;;  %v257_v29 = vmul.f32 %v3432_v38, %v3491_v10 }
  0xa1   :  { %v135_v30 = vmul.f32 %v3455_v56, %v74_v51  ;;  %v451_v31 = vrot.slane %v3486_v8, 4  ;;  %v534_v32 = vrot.slane %v3489_v9, 5  ;;  %v3514_v33 = vmul.f32 %v3446_v50, %v74_v51 }
  0xa2   :  { %v3518_v39 = vmul.f32 %v3455_v56, %v104_v24  ;;  %v3521_v40 = vmul.f32 %v3430_v37, %v104_v24  ;;  %v203_v41 = vrot.slane %v174_v28, 1  ;;  %v3524_v48 = vmul.f32 %v3432_v38, %v104_v24  ;;  %v3118_v28 = vld [vmem:[#allocation2 + $0x104] ss:$8 sps:$4 sm:$0xff]   ;;  %v3554_v46 = vpop.permute.xlu1 %113 }
  0xa3   :  { %v136_v51 = vmul.f32 %v3455_v56, %v3491_v10  ;;  %v286_v54 = vrot.slane %v257_v29, 2  ;;  %v340_v55 = vmul.f32 %v3438_v43, %v3491_v10  ;;  %v423_v1 = vmul.f32 %v3440_v44, %v3491_v10  ;;  %1586 = vmatprep.subr.bf16.mxu1 %v3118_v28 }
  0xa4   :  { %v204_v60 = vsel %vm201_vm1, %v202_v23, %v203_v41  ;;  %v206_v61 = vsel %vm201_vm1, %v203_v41, %v4528_v6  ;;  %v3538_v2 = vmul.f32 %v3442_v45, %v3491_v10  ;;  %v3542_v12 = vmul.f32 %v3438_v43, %v104_v24  ;;  %v3115_v23 = vld [vmem:[#allocation2 + $0x4] ss:$8 sps:$4 sm:$0xff]   ;;  %1587 = vmatpush1.bf16.msra.mxu1 %v3120_v0 }
  0xa5   :  { %v3545_v17 = vmul.f32 %v3440_v44, %v104_v24  ;;  %v240_v18 = vadd.f32 %v204_v60, %v135_v30  ;;  %v215_v29 = vrot.slane %v3521_v40, 1  ;;  %v3549_v34 = vmul.f32 %v3442_v45, %v104_v24  ;;  %1513 = vmatprep.subr.bf16.mxu0 %v3115_v23 }
  0xa6   :  { %v3552_v35 = vmul.f32 %v3444_v49, %v104_v24  ;;  %v241_v41 = vadd.f32 %v206_v61, %v136_v51  ;;  %v3557_v6 = vmul.f32 %v3446_v50, %v104_v24  ;;  %v287_v30 = vsel %vm284_vm2, %v285_v26, %v286_v54  ;;  %1514 = vmatpush1.bf16.msra.mxu0 %v3117_v4  ;;  %v3123_v24 = vld [vmem:[#allocation2 + $0xf0] ss:$8 sps:$4 sm:$0xff]  }
  0xa7   :  { %v369_v47 = vrot.slane %v340_v55, 3  ;;  %v3562_v60 = vmul.f32 %v3444_v49, %v3491_v10  ;;  %v298_v22 = vrot.slane %v3524_v48, 2  ;;  %v323_v11 = vadd.f32 %v287_v30, %v240_v18  ;;  %v3121_v18 = vld [vmem:[#allocation2 + $0xf4] ss:$8 sps:$4 sm:$0xff]   ;;  %v3581_v30 = vpop.permute.xlu0 %108 }
  0xa8   :  { %v452_v21 = vrot.slane %v423_v1, 4  ;;  %v535_v51 = vrot.slane %v3538_v2, 5  ;;  %v289_v26 = vsel %vm284_vm2, %v286_v54, %v4529_v7  ;;  %v3573_v55 = vmul.f32 %v3430_v37, %v3554_v46  ;;  %v3124_v1 = vld [vmem:[#allocation2 + $0x1f4] ss:$8 sps:$4 sm:$0xff]   ;;  %v3126_v54 = vld [vmem:[#allocation2 + $0x1f0] ss:$8 sps:$4 sm:$0xff]   ;;  %1515 = vmatprep.subr.bf16.mxu0 %v3121_v18 }
  0xa9   :  { %v324_v23 = vadd.f32 %v289_v26, %v241_v41  ;;  %v3579_v28 = vmul.f32 %v3446_v50, %v3491_v10  ;;  %v370_v7 = vsel %vm367_vm3, %v368_v27, %v369_v47  ;;  %v372_v0 = vsel %vm367_vm3, %v369_v47, %v4531_v14  ;;  %1588 = vmatprep.subr.bf16.mxu1 %v3124_v1  ;;  %v3129_v1 = vld [vmem:[#allocation2 + $0xe0] ss:$8 sps:$4 sm:$0xff]   ;;  %v3135_v14 = vld [vmem:[#allocation2 + $0xd0] ss:$8 sps:$4 sm:$0xff]  }
  0xaa   :  { %v3592_v41 = vmul.f32 %v3432_v38, %v3554_v46  ;;  %v406_v10 = vadd.f32 %v370_v7, %v323_v11  ;;  %v453_v26 = vsel %vm450_vm4, %v451_v31, %v452_v21  ;;  %v455_v3 = vsel %vm450_vm4, %v452_v21, %v4530_v15  ;;  %1516 = vmatpush2.bf16.msra.mxu0 %v3123_v24  ;;  %v3127_v31 = vld [vmem:[#allocation2 + $0xe4] ss:$8 sps:$4 sm:$0xff]   ;;  %v3132_v15 = vld [vmem:[#allocation2 + $0x1e0] ss:$8 sps:$4 sm:$0xff]  }
  0xab   :  { %v536_v27 = vsel %vm533_vm5, %v534_v32, %v535_v51  ;;  %v4533_v47 = vrot.slane %v3573_v55, 1  ;;  %v3606_v18 = vmul.f32 %v3438_v43, %v3554_v46  ;;  %v181_v7 = vmul.f32 %v3430_v37, %v3581_v30  ;;  %1589 = vmatpush2.bf16.msra.mxu1 %v3126_v54  ;;  %v3130_v21 = vld [vmem:[#allocation2 + $0x1e4] ss:$8 sps:$4 sm:$0xff]   ;;  %1517 = vmatprep.subr.bf16.mxu0 %v3127_v31  ;;  %v3136_v31 = vld [vmem:[#allocation2 + $0x1d4] ss:$8 sps:$4 sm:$0xff]  }
  0xac   :  { %v264_v8 = vmul.f32 %v3432_v38, %v3581_v30  ;;  %v407_v9 = vadd.f32 %v372_v0, %v324_v23  ;;  %v538_v32 = vsel %vm533_vm5, %v535_v51, %v4532_v19  ;;  %v3617_v11 = vmul.f32 %v3440_v44, %v3554_v46  ;;  %1590 = vmatprep.subr.bf16.mxu1 %v3130_v21 }
  0xad   :  { %v347_v24 = vmul.f32 %v3438_v43, %v3581_v30  ;;  %v216_v54 = vrot.slane %v181_v7, 1  ;;  %v430_v23 = vmul.f32 %v3440_v44, %v3581_v30  ;;  %v489_v0 = vadd.f32 %v453_v26, %v406_v10 }
  0xae   :  { %v299_v4 = vrot.slane %v264_v8, 2  ;;  %v3627_v19 = vmul.f32 %v3442_v45, %v3554_v46  ;;  %v142_v61 = vmul.f32 %v3455_v56, %v3581_v30  ;;  %1518 = vmatpush2.bf16.msra.mxu0 %v3129_v1  ;;  %v3133_v8 = vld [vmem:[#allocation2 + $0xd4] ss:$8 sps:$4 sm:$0xff]   ;;  %v490_v21 = vadd.f32 %v455_v3, %v407_v9 }
  0xaf   :  { %v217_v7 = vsel %vm201_vm1, %v215_v29, %v216_v54  ;;  %v219_v10 = vsel %vm201_vm1, %v216_v54, %v4533_v47  ;;  %v382_v26 = vrot.slane %v347_v24, 3  ;;  %1591 = vmatpush2.bf16.msra.mxu1 %v3132_v15  ;;  %v4536_v51 = vrot.slane %v3617_v11, 4  ;;  %1519 = vmatprep.subr.bf16.mxu0 %v3133_v8  ;;  %v3142_v47 = vld [vmem:[#allocation2 + $0x1c4] ss:$8 sps:$4 sm:$0xff]  }
  0xb0   :  { %v246_v2 = vadd.f32 %v217_v7, %v3518_v39  ;;  %v247_v1 = vadd.f32 %v219_v10, %v142_v61  ;;  %v300_v40 = vsel %vm284_vm2, %v298_v22, %v299_v4  ;;  %v4558_v29 = vrot.slane %v3592_v41, 2  ;;  %v3139_v22 = vld [vmem:[#allocation2 + $0xc4] ss:$8 sps:$4 sm:$0xff]   ;;  %v3141_v10 = vld [vmem:[#allocation2 + $0xc0] ss:$8 sps:$4 sm:$0xff]   ;;  %1592 = vmatprep.subr.bf16.mxu1 %v3136_v31 }
  0xb1   :  { %v465_v24 = vrot.slane %v430_v23, 4  ;;  %v513_v15 = vmul.f32 %v3442_v45, %v3581_v30  ;;  %v572_v3 = vadd.f32 %v536_v27, %v489_v0  ;;  %v4559_v9 = vrot.slane %v3562_v60, 6 }
  0xb2   :  { %v302_v54 = vsel %vm284_vm2, %v299_v4, %v4558_v29  ;;  %v4560_v39 = vrot.slane %v3499_v16, 6  ;;  %v329_v7 = vadd.f32 %v300_v40, %v246_v2  ;;  %1520 = vmatpush2.bf16.msra.mxu0 %v3135_v14  ;;  %v4534_v4 = vrot.slane %v3627_v19, 5  ;;  %v3145_v2 = vld [vmem:[#allocation2 + $0xb4] ss:$8 sps:$4 sm:$0xff]  }
  0xb3   :  { %v330_v48 = vadd.f32 %v302_v54, %v247_v1  ;;  %v3656_v23 = vmul.f32 %v3444_v49, %v3554_v46  ;;  %v4561_v27 = vrot.slane %v3542_v12, 3  ;;  %v4562_v16 = vrot.slane %v3606_v18, 3  ;;  %v3670_v54 = vpop.permute.xlu1 %93  ;;  %1593 = vmatpush2.bf16.msra.mxu1 %v3138_v36  ;;  %v3144_v12 = vld [vmem:[#allocation2 + $0x1c0] ss:$8 sps:$4 sm:$0xff]   ;;  %1521 = vmatprep.subr.bf16.mxu0 %v3139_v22  ;;  %v3147_v36 = vld [vmem:[#allocation2 + $0xb0] ss:$8 sps:$4 sm:$0xff]  }
  0xb4   :  { %v619_v61 = vsel %vm616_vm6, %v4560_v39, %v4559_v9  ;;  %v3666_v14 = vmul.f32 %v3446_v50, %v3554_v46  ;;  %v596_v29 = vmul.f32 %v3444_v49, %v3581_v30  ;;  %v573_v9 = vadd.f32 %v538_v32, %v490_v21  ;;  %1594 = vmatprep.subr.bf16.mxu1 %v3142_v47 }
  0xb5   :  { %v383_v0 = vsel %vm367_vm3, %v4561_v27, %v382_v26  ;;  %v385_v8 = vsel %vm367_vm3, %v382_v26, %v4562_v16  ;;  %v4563_v39 = vrot.slane %v3545_v17, 4  ;;  %v468_v31 = vsel %vm450_vm4, %v465_v24, %v4536_v51 }
  0xb6   :  { %v412_v1 = vadd.f32 %v383_v0, %v329_v7  ;;  %v413_v40 = vadd.f32 %v385_v8, %v330_v48  ;;  %v548_v27 = vrot.slane %v513_v15, 5  ;;  %v3148_v7 = vld [vmem:[#allocation2 + $0x1b4] ss:$8 sps:$4 sm:$0xff]   ;;  %v713_v48 = vrot.slane %v3557_v6, 7  ;;  %1522 = vmatpush2.bf16.msra.mxu0 %v3141_v10 }
  0xb7   :  { %v466_v26 = vsel %vm450_vm4, %v4563_v39, %v465_v24  ;;  %v655_v0 = vadd.f32 %v619_v61, %v572_v3  ;;  %v4564_v32 = vrot.slane %v3467_v62, 6  ;;  %v4565_v17 = vrot.slane %v3562_v60, 6  ;;  %1523 = vmatprep.subr.bf16.mxu0 %v3145_v2  ;;  %v3151_v61 = vld [vmem:[#allocation2 + $0xa4] ss:$8 sps:$4 sm:$0xff]   ;;  %1595 = vmatpush2.bf16.msra.mxu1 %v3144_v12 }
  0xb8   :  { %v495_v16 = vadd.f32 %v466_v26, %v412_v1  ;;  %v496_v8 = vadd.f32 %v468_v31, %v413_v40  ;;  %v4566_v39 = vrot.slane %v3579_v28, 7  ;;  %v4567_v24 = vrot.slane %v3514_v33, 7  ;;  %v3707_v40 = vpop.permute.xlu0 %88  ;;  %v3150_v26 = vld [vmem:[#allocation2 + $0x1b0] ss:$8 sps:$4 sm:$0xff]   ;;  %1596 = vmatprep.subr.bf16.mxu1 %v3148_v7  ;;  %v3157_v7 = vld [vmem:[#allocation2 + $0x94] ss:$8 sps:$4 sm:$0xff]  }
  0xb9   :  { %v621_v21 = vsel %vm616_vm6, %v4565_v17, %v4564_v32  ;;  %v3691_v3 = vmul.f32 %v3455_v56, %v3554_v46  ;;  %v3695_v47 = vmul.f32 %v3430_v37, %v3670_v54  ;;  %v4568_v60 = vrot.slane %v3470_v63, 7 }
  0xba   :  { %v702_v15 = vsel %vm699_vm7, %v4567_v24, %v4566_v39  ;;  %v4569_v22 = vmov %v4566_v39  ;;  %v4535_v33 = vrot.slane %v3656_v23, 6  ;;  %v631_v1 = vrot.slane %v596_v29, 6  ;;  %1524 = vmatpush2.bf16.msra.mxu0 %v3147_v36 }
  0xbb   :  { %v3702_v10 = vsel %vm699_vm7, %v4569_v22, %v4568_v60  ;;  %v679_v46 = vmul.f32 %v3446_v50, %v3581_v30  ;;  %v4538_v2 = vrot.slane %v3666_v14, 7  ;;  %v4570_v31 = vrot.slane %v3549_v34, 5  ;;  %v3154_v30 = vld [vmem:[#allocation2 + $0x1a4] ss:$8 sps:$4 sm:$0xff]   ;;  %v3153_v60 = vld [vmem:[#allocation2 + $0xa0] ss:$8 sps:$4 sm:$0xff]   ;;  %1525 = vmatprep.subr.bf16.mxu0 %v3151_v61  ;;  %1597 = vmatpush2.bf16.msra.mxu1 %v3150_v26 }
  0xbc   :  { %v551_v28 = vsel %vm533_vm5, %v548_v27, %v4534_v4  ;;  %v3718_v29 = vmul.f32 %v3432_v38, %v3670_v54  ;;  %v656_v17 = vadd.f32 %v621_v21, %v573_v9  ;;  %v3720_v39 = vadd.f32 %v702_v15, %v655_v0  ;;  %v3156_v21 = vld [vmem:[#allocation2 + $0x1a0] ss:$8 sps:$4 sm:$0xff]   ;;  %1598 = vmatprep.subr.bf16.mxu1 %v3154_v30  ;;  %v3159_v26 = vld [vmem:[#allocation2 + $0x90] ss:$8 sps:$4 sm:$0xff]  }
  0xbd   :  { %v549_v32 = vsel %vm533_vm5, %v4570_v31, %v548_v27  ;;  %v579_v24 = vadd.f32 %v551_v28, %v496_v8  ;;  %v4539_v34 = vrot.slane %v3695_v47, 1  ;;  %v176_v22 = vmul.f32 %v3430_v37, %v3707_v40  ;;  %v3160_v28 = vld [vmem:[#allocation2 + $0x194] ss:$8 sps:$4 sm:$0xff]  }
  0xbe   :  { %v578_v12 = vadd.f32 %v549_v32, %v495_v16  ;;  %v259_v27 = vmul.f32 %v3432_v38, %v3707_v40  ;;  %v342_v31 = vmul.f32 %v3438_v43, %v3707_v40  ;;  %v4571_v9 = vrot.slane %v3552_v35, 6  ;;  %1526 = vmatpush2.bf16.msra.mxu0 %v3153_v60 }
  0xbf   :  { %v634_v16 = vsel %vm616_vm6, %v631_v1, %v4535_v33  ;;  %v714_v8 = vrot.slane %v679_v46, 7  ;;  %v3737_v36 = vmul.f32 %v3438_v43, %v3670_v54  ;;  %v4537_v15 = vrot.slane %v3718_v29, 2  ;;  %1527 = vmatprep.subr.bf16.mxu0 %v3157_v7  ;;  %1599 = vmatpush2.bf16.msra.mxu1 %v3156_v21 }
  0xc0   :  { %v632_v0 = vsel %vm616_vm6, %v4571_v9, %v631_v1  ;;  %v3742_v61 = vmul.f32 %v3440_v44, %v3670_v54  ;;  %v207_v35 = vrot.slane %v176_v22, 1  ;;  %v290_v32 = vrot.slane %v259_v27, 2  ;;  %1600 = vmatprep.subr.bf16.mxu1 %v3160_v28 }
  0xc1   :  { %v661_v9 = vadd.f32 %v632_v0, %v578_v12  ;;  %v662_v4 = vadd.f32 %v634_v16, %v579_v24  ;;  %v3746_v1 = vmul.f32 %v3442_v45, %v3670_v54  ;;  %v138_v46 = vmul.f32 %v3455_v56, %v3707_v40  ;;  %v3163_v24 = vld [vmem:[#allocation2 + $0x84] ss:$8 sps:$4 sm:$0xff]   ;;  %v3162_v0 = vld [vmem:[#allocation2 + $0x190] ss:$8 sps:$4 sm:$0xff]  }
  0xc2   :  { %v4572_v33 = vrot.slane %v3449_v52, 1  ;;  %v210_v30 = vsel %vm201_vm1, %v207_v35, %v4539_v34  ;;  %v373_v22 = vrot.slane %v342_v31, 3  ;;  %v425_v12 = vmul.f32 %v3440_v44, %v3707_v40  ;;  %1528 = vmatpush2.bf16.msra.mxu0 %v3159_v26 }
  0xc3   :  { %v715_v27 = vsel %vm699_vm7, %v713_v48, %v714_v8  ;;  %v717_v52 = vsel %vm699_vm7, %v714_v8, %v4538_v2  ;;  %v243_v60 = vadd.f32 %v210_v30, %v138_v46  ;;  %v4542_v31 = vrot.slane %v3737_v36, 3  ;;  %v3166_v8 = vld [vmem:[#allocation2 + $0x184] ss:$8 sps:$4 sm:$0xff]   ;;  %v3165_v46 = vld [vmem:[#allocation2 + $0x80] ss:$8 sps:$4 sm:$0xff]   ;;  %1529 = vmatprep.subr.bf16.mxu0 %v3163_v24  ;;  %1601 = vmatpush2.bf16.msra.mxu1 %v3162_v0 }
  0xc4   :  { %v208_v51 = vsel %vm201_vm1, %v4572_v33, %v207_v35  ;;  %v4573_v16 = vrot.slane %v3452_v53, 2  ;;  %v293_v6 = vsel %vm284_vm2, %v290_v32, %v4537_v15  ;;  %v508_v48 = vmul.f32 %v3442_v45, %v3707_v40  ;;  %v3782_v35 = vpop.permute.xlu1 %123  ;;  %v3171_v2 = vld [vmem:[#allocation2 + $0x274] ss:$8 sps:$4 sm:$0xff]   ;;  %1602 = vmatprep.subr.bf16.mxu1 %v3166_v8 }
  0xc5   :  { %v242_v33 = vadd.f32 %v208_v51, %v3494_v13  ;;  %v3776_v13 = vmul.f32 %v3444_v49, %v3670_v54  ;;  %v3780_v51 = vmul.f32 %v3446_v50, %v3670_v54  ;;  %v326_v21 = vadd.f32 %v293_v6, %v243_v60  ;;  %v3811_v60 = vpop.permute.xlu0 %118 }
  0xc6   :  { %v291_v7 = vsel %vm284_vm2, %v4573_v16, %v290_v32  ;;  %v3784_v32 = vadd.f32 %v715_v27, %v661_v9  ;;  %v3786_v30 = vadd.f32 %v717_v52, %v662_v4  ;;  %v4575_v28 = vrot.slane %v3458_v57, 3  ;;  %v3168_v4 = vld [vmem:[#allocation2 + $0x180] ss:$8 sps:$4 sm:$0xff]   ;;  %1530 = vmatpush2.bf16.msra.mxu0 %v3165_v46 }
  0xc7   :  { %v325_v53 = vadd.f32 %v291_v7, %v242_v33  ;;  %v456_v15 = vrot.slane %v425_v12, 4  ;;  %v3792_v34 = vadd.f32 %v3702_v10, %v656_v17  ;;  %v3796_v33 = vmul.f32 %v3455_v56, %v3670_v54  ;;  %1645 = vmatprep.subr.bf16.mxu0 %v3171_v2  ;;  %1603 = vmatpush2.bf16.msra.mxu1 %v3168_v4 }
  0xc8   :  { %4574 = vst [vmem:[#allocation13_spill] sm:$0xff] %v3786_v30  ;;  %v374_v16 = vsel %vm367_vm3, %v4575_v28, %v373_v22  ;;  %v591_v9 = vmul.f32 %v3444_v49, %v3707_v40  ;;  %v4541_v57 = vrot.slane %v3742_v61, 4  ;;  %v376_v12 = vsel %vm367_vm3, %v373_v22, %v4542_v31 }
  0xc9   :  { %v408_v26 = vadd.f32 %v374_v16, %v325_v53  ;;  %v539_v24 = vrot.slane %v508_v48, 5  ;;  %v3806_v10 = vmul.f32 %v3430_v37, %v3782_v35  ;;  %v4540_v54 = vrot.slane %v3746_v1, 5 }
  0xca   :  { %v4544_v17 = vrot.slane %v3776_v13, 6  ;;  %v4543_v27 = vrot.slane %v3780_v51, 7  ;;  %v409_v52 = vadd.f32 %v376_v12, %v326_v21  ;;  %v3815_v0 = vadd.f32 %v3786_v30, %v3784_v32 }
  0xcb   :  { %v3819_v22 = vmul.f32 %v3784_v32, %v3784_v32  ;;  %v4576_v7 = vrot.slane %v3461_v58, 4  ;;  %v674_v48 = vmul.f32 %v3446_v50, %v3707_v40  ;;  %v3828_v8 = vmul.f32 %v3786_v30, %v3786_v30 }
  0xcc   :  { %v622_v21 = vrot.slane %v591_v9, 6  ;;  %v145_v46 = vmul.f32 %v3455_v56, %v3782_v35  ;;  %v459_v58 = vsel %vm450_vm4, %v456_v15, %v4541_v57  ;;  %v4577_v28 = vrot.slane %v3464_v59, 5 }
  0xcd   :  { %v457_v6 = vsel %vm450_vm4, %v4576_v7, %v456_v15  ;;  %v222_v40 = vrot.slane %v3806_v10, 1  ;;  %v183_v2 = vmul.f32 %v3430_v37, %v3811_v60  ;;  %v492_v12 = vadd.f32 %v459_v58, %v409_v52 }
  0xce   :  { %v491_v53 = vadd.f32 %v457_v6, %v408_v26  ;;  %v540_v16 = vsel %vm533_vm5, %v4577_v28, %v539_v24  ;;  %v542_v26 = vsel %vm533_vm5, %v539_v24, %v4540_v54  ;;  %v267_v9 = vmul.f32 %v3432_v38, %v3782_v35 }
  0xcf   :  { %v266_v15 = vmul.f32 %v3432_v38, %v3811_v60  ;;  %v705_v4 = vrot.slane %v674_v48, 7  ;;  %v3850_v59 = vmul.f32 %v3438_v43, %v3782_v35  ;;  %v3854_v10 = vmul.f32 %v3440_v44, %v3782_v35 }
  0xd0   :  { %v220_v52 = vrot.slane %v183_v2, 1  ;;  %v574_v7 = vadd.f32 %v540_v16, %v491_v53  ;;  %v4578_v6 = vrot.slane %v3467_v62, 6  ;;  %v625_v58 = vsel %vm616_vm6, %v622_v21, %v4544_v17 }
  0xd1   :  { %v144_v48 = vmul.f32 %v3455_v56, %v3811_v60  ;;  %v4579_v28 = vrot.slane %v3573_v55, 1  ;;  %v303_v31 = vrot.slane %v266_v15, 2  ;;  %v349_v53 = vmul.f32 %v3438_v43, %v3811_v60 }
  0xd2   :  { %v623_v24 = vsel %vm616_vm6, %v4578_v6, %v622_v21  ;;  %v223_v57 = vsel %vm201_vm1, %v220_v52, %v222_v40  ;;  %v575_v62 = vadd.f32 %v542_v26, %v492_v12  ;;  %v305_v16 = vrot.slane %v267_v9, 2  ;;  %v3875_v6 = vpop.permute.xlu1 %128 }
  0xd3   :  { %v221_v54 = vsel %vm201_vm1, %v4579_v28, %v220_v52  ;;  %v3872_v2 = vmul.f32 %v3442_v45, %v3782_v35  ;;  %v4580_v55 = vrot.slane %v3470_v63, 7  ;;  %v3883_v15 = vsel %vm699_vm7, %v705_v4, %v4543_v27 }
  0xd4   :  { %v248_v21 = vadd.f32 %v221_v54, %v3691_v3  ;;  %v3887_v12 = vmul.f32 %v3444_v49, %v3782_v35  ;;  %v249_v26 = vadd.f32 %v223_v57, %v144_v48  ;;  %v657_v9 = vadd.f32 %v623_v24, %v574_v7 }
  0xd5   :  { %v706_v28 = vsel %vm699_vm7, %v4580_v55, %v705_v4  ;;  %v388_v52 = vrot.slane %v3850_v59, 3  ;;  %v471_v3 = vrot.slane %v3854_v10, 4  ;;  %v3893_v63 = vmul.f32 %v3446_v50, %v3782_v35 }
  0xd6   :  { %v4581_v54 = vrot.slane %v3592_v41, 2  ;;  %v386_v4 = vrot.slane %v349_v53, 3  ;;  %v432_v27 = vmul.f32 %v3440_v44, %v3811_v60  ;;  %v3902_v57 = vmul.f32 %v3430_v37, %v3875_v6 }
  0xd7   :  { %v3904_v7 = vadd.f32 %v625_v58, %v575_v62  ;;  %v554_v59 = vrot.slane %v3872_v2, 5  ;;  %v306_v10 = vsel %vm284_vm2, %v303_v31, %v305_v16  ;;  %v637_v24 = vrot.slane %v3887_v12, 6 }
  0xd8   :  { %v304_v55 = vsel %vm284_vm2, %v4581_v54, %v303_v31  ;;  %v332_v41 = vadd.f32 %v306_v10, %v249_v26  ;;  %v4550_v48 = vrot.slane %v3902_v57, 1  ;;  %v3912_v53 = vmul.f32 %v3432_v38, %v3875_v6 }
  0xd9   :  { %v331_v35 = vadd.f32 %v304_v55, %v248_v21  ;;  %v515_v58 = vmul.f32 %v3442_v45, %v3811_v60  ;;  %v3919_v62 = vmul.f32 %v3438_v43, %v3875_v6  ;;  %v3923_v31 = vmul.f32 %v3440_v44, %v3875_v6 }
  0xda   :  { %v3925_v2 = vadd.f32 %v706_v28, %v657_v9  ;;  %v4582_v21 = vrot.slane %v3606_v18, 3  ;;  %v389_v26 = vsel %vm367_vm3, %v386_v4, %v388_v52  ;;  %v469_v55 = vrot.slane %v432_v27, 4 }
  0xdb   :  { %v598_v17 = vmul.f32 %v3444_v49, %v3811_v60  ;;  %v225_v54 = vsel %vm201_vm1, %v222_v40, %v4550_v48  ;;  %v4549_v25 = vrot.slane %v3912_v53, 2  ;;  %v415_v20 = vadd.f32 %v389_v26, %v332_v41 }
  0xdc   :  { %v387_v12 = vsel %vm367_vm3, %v4582_v21, %v386_v4  ;;  %v250_v28 = vadd.f32 %v225_v54, %v145_v46  ;;  %v390_v9 = vrot.slane %v3919_v62, 3  ;;  %v3940_v18 = vmul.f32 %v3442_v45, %v3875_v6  ;;  %v3950_v21 = vpop.permute.xlu0 %98 }
  0xdd   :  { %v414_v10 = vadd.f32 %v387_v12, %v331_v35  ;;  %v552_v4 = vrot.slane %v515_v58, 5  ;;  %v308_v27 = vsel %vm284_vm2, %v305_v16, %v4549_v25  ;;  %v3948_v40 = vmul.f32 %v3444_v49, %v3875_v6 }
  0xde   :  { %v4583_v46 = vrot.slane %v3617_v11, 4  ;;  %v472_v54 = vsel %vm450_vm4, %v469_v55, %v471_v3  ;;  %v681_v58 = vmul.f32 %v3446_v50, %v3811_v60  ;;  %v333_v12 = vadd.f32 %v308_v27, %v250_v28 }
  0xdf   :  { %v635_v16 = vrot.slane %v598_v17, 6  ;;  %v391_v25 = vsel %vm367_vm3, %v388_v52, %v390_v9  ;;  %v556_v48 = vrot.slane %v3940_v18, 5  ;;  %v498_v35 = vadd.f32 %v472_v54, %v415_v20 }
  0xe0   :  { %v470_v41 = vsel %vm450_vm4, %v4583_v46, %v469_v55  ;;  %v416_v30 = vadd.f32 %v391_v25, %v333_v12  ;;  %v3964_v11 = vmul.f32 %v3430_v37, %v3950_v21  ;;  %v3968_v55 = vmul.f32 %v3432_v38, %v3950_v21 }
  0xe1   :  { %v497_v26 = vadd.f32 %v470_v41, %v414_v10  ;;  %v4584_v60 = vrot.slane %v3627_v19, 5  ;;  %v4585_v10 = vrot.slane %v3923_v31, 4  ;;  %v4555_v28 = vrot.slane %v3948_v40, 6 }
  0xe2   :  { %v3979_v20 = vmul.f32 %v3446_v50, %v3875_v6  ;;  %v555_v25 = vsel %vm533_vm5, %v552_v4, %v554_v59  ;;  %v718_v27 = vrot.slane %v681_v58, 7  ;;  %v4552_v41 = vrot.slane %v3964_v11, 1 }
  0xe3   :  { %v553_v17 = vsel %vm533_vm5, %v4584_v60, %v552_v4  ;;  %v474_v52 = vsel %vm450_vm4, %v471_v3, %v4585_v10  ;;  %v557_v19 = vsel %vm533_vm5, %v554_v59, %v556_v48  ;;  %v4553_v12 = vrot.slane %v3968_v55, 2 }
  0xe4   :  { %v499_v46 = vadd.f32 %v474_v52, %v416_v30  ;;  %v580_v54 = vadd.f32 %v553_v17, %v497_v26  ;;  %v3989_v3 = vmul.f32 %v3438_v43, %v3950_v21  ;;  %v581_v60 = vadd.f32 %v555_v25, %v498_v35  ;;  %v167_v17 = vpop.permute.xlu1 %166 }
  0xe5   :  { %v4586_v10 = vrot.slane %v3656_v23, 6  ;;  %v4587_v30 = vrot.slane %v3695_v47, 1  ;;  %v638_v59 = vsel %vm616_vm6, %v635_v16, %v637_v24  ;;  %v640_v52 = vsel %vm616_vm6, %v637_v24, %v4555_v28 }
  0xe6   :  { %v582_v58 = vadd.f32 %v557_v19, %v499_v46  ;;  %v4554_v35 = vrot.slane %v3979_v20, 7  ;;  %v4588_v25 = vrot.slane %v3666_v14, 7  ;;  %v4589_v19 = vrot.slane %v3893_v63, 7 }
  0xe7   :  { %v636_v4 = vsel %vm616_vm6, %v4586_v10, %v635_v16  ;;  %v212_v26 = vsel %vm201_vm1, %v4587_v30, %v4552_v41  ;;  %v4013_v16 = vmul.f32 %v3440_v44, %v3950_v21  ;;  %v4590_v24 = vrot.slane %v3718_v29, 2 }
  0xe8   :  { %v244_v23 = vadd.f32 %v212_v26, %v3796_v33  ;;  %v719_v46 = vsel %vm699_vm7, %v4588_v25, %v718_v27  ;;  %v721_v47 = vsel %vm699_vm7, %v718_v27, %v4589_v19  ;;  %v665_v10 = vadd.f32 %v640_v52, %v582_v58 }
  0xe9   :  { %v663_v30 = vadd.f32 %v636_v4, %v580_v54  ;;  %v295_v33 = vsel %vm284_vm2, %v4590_v24, %v4553_v12  ;;  %v377_v14 = vrot.slane %v3989_v3, 3  ;;  %v186_v26 = vmul.f32 %v3430_v37, %v167_v17 }
  0xea   :  { %v664_v25 = vadd.f32 %v638_v59, %v581_v60  ;;  %v327_v41 = vadd.f32 %v295_v33, %v244_v23  ;;  %v269_v27 = vmul.f32 %v3432_v38, %v167_v17  ;;  %v352_v58 = vmul.f32 %v3438_v43, %v167_v17 }
  0xeb   :  { %v4591_v54 = vmov %v4589_v19  ;;  %v4031_v29 = vmul.f32 %v3442_v45, %v3950_v21  ;;  %v226_v52 = vrot.slane %v186_v26, 1  ;;  %v435_v19 = vmul.f32 %v3440_v44, %v167_v17 }
  0xec   :  { %v723_v4 = vsel %vm699_vm7, %v4591_v54, %v4554_v35  ;;  %v460_v60 = vrot.slane %v4013_v16, 4  ;;  %v146_v59 = vmul.f32 %v3455_v56, %v3875_v6  ;;  %v309_v23 = vrot.slane %v269_v27, 2 }
  0xed   :  { %v4034_v24 = vadd.f32 %v723_v4, %v665_v10  ;;  %v4592_v63 = vrot.slane %v3737_v36, 3  ;;  %v4593_v54 = vrot.slane %v3902_v57, 1  ;;  %v392_v12 = vrot.slane %v352_v58, 3 }
  0xee   :  { %v518_v10 = vmul.f32 %v3442_v45, %v167_v17  ;;  %v4048_v4 = vadd.f32 %v719_v46, %v663_v30  ;;  %v4050_v35 = vadd.f32 %v721_v47, %v664_v25  ;;  %v4054_v27 = vmul.f32 %v3444_v49, %v3950_v21 }
  0xef   :  { %v378_v33 = vsel %vm367_vm3, %v4592_v63, %v377_v14  ;;  %v227_v26 = vsel %vm201_vm1, %v4593_v54, %v226_v52  ;;  %v4594_v36 = vrot.slane %v3912_v53, 2  ;;  %v475_v57 = vrot.slane %v435_v19, 4 }
  0xf0   :  { %v410_v28 = vadd.f32 %v378_v33, %v327_v41  ;;  %v251_v6 = vadd.f32 %v227_v26, %v146_v59  ;;  %v601_v52 = vmul.f32 %v3444_v49, %v167_v17  ;;  %v543_v58 = vrot.slane %v4031_v29, 5 }
  0xf1   :  { %v310_v63 = vsel %vm284_vm2, %v4594_v36, %v309_v23  ;;  %v4063_v46 = vmul.f32 %v3446_v50, %v3950_v21  ;;  %v785_v41 = vmul.f32 0.0, %v4034_v24  ;;  %v4595_v30 = vrot.slane %v3742_v61, 4 }
  0xf2   :  { %v334_v47 = vadd.f32 %v310_v63, %v251_v6  ;;  %v393_v25 = vsel %vm367_vm3, %v390_v9, %v392_v12  ;;  %v558_v19 = vrot.slane %v518_v10, 5  ;;  %v684_v59 = vmul.f32 %v3446_v50, %v167_v17  ;;  %v162_v12 = vpop.permute.xlu0 %161 }
  0xf3   :  { %v461_v53 = vsel %vm450_vm4, %v4595_v30, %v460_v60  ;;  %v4077_v23 = vadd.f32 %v3883_v15, %v3904_v7  ;;  %v818_v33 = vmul.f32 %v4048_v4, %v4048_v4  ;;  %v626_v61 = vrot.slane %v4054_v27, 6 }
  0xf4   :  { %v493_v54 = vadd.f32 %v461_v53, %v410_v28  ;;  %v417_v26 = vadd.f32 %v393_v25, %v334_v47  ;;  %v4596_v6 = vrot.slane %v3923_v31, 4  ;;  %v641_v36 = vrot.slane %v601_v52, 6 }
  0xf5   :  { %v784_v9 = vmul.f32 %v3481_v5, %v4050_v35  ;;  %v4597_v15 = vrot.slane %v3746_v1, 5  ;;  %v709_v28 = vrot.slane %v4063_v46, 7  ;;  %v820_v17 = vmul.f32 %v785_v41, %v4034_v24 }
  0xf6   :  { %v476_v62 = vsel %vm450_vm4, %v4596_v6, %v475_v57  ;;  %v559_v31 = vsel %vm533_vm5, %v556_v48, %v558_v19  ;;  %v724_v63 = vrot.slane %v684_v59, 7  ;;  %v799_v57 = vadd.f32 %v3815_v0, %v4048_v4 }
  0xf7   :  { %v544_v7 = vsel %vm533_vm5, %v4597_v15, %v543_v58  ;;  %v500_v10 = vadd.f32 %v476_v62, %v417_v26  ;;  %v833_v52 = vadd.f32 %v3828_v8, %v3819_v22  ;;  %v179_v30 = vmul.f32 %v3430_v37, %v162_v12 }
  0xf8   :  { %v576_v47 = vadd.f32 %v544_v7, %v493_v54  ;;  %v262_v53 = vmul.f32 %v3432_v38, %v162_v12  ;;  %v4598_v25 = vrot.slane %v3948_v40, 6  ;;  %v819_v18 = vmul.f32 %v784_v9, %v4050_v35 }
  0xf9   :  { %v583_v1 = vadd.f32 %v559_v31, %v500_v10  ;;  %v834_v48 = vadd.f32 %v833_v52, %v818_v33  ;;  %v345_v19 = vmul.f32 %v3438_v43, %v162_v12  ;;  %v140_v0 = vmul.f32 %v3455_v56, %v3950_v21 }
  0xfa   :  { %v642_v26 = vsel %vm616_vm6, %v4598_v25, %v641_v36  ;;  %v213_v22 = vrot.slane %v179_v30, 1  ;;  %v296_v8 = vrot.slane %v262_v53, 2  ;;  %v4599_v54 = vrot.slane %v3979_v20, 7 }
  0xfb   :  { %v666_v59 = vadd.f32 %v642_v26, %v583_v1  ;;  %v800_v38 = vadd.f32 %v799_v57, %v784_v9  ;;  %v379_v6 = vrot.slane %v345_v19, 3  ;;  %v428_v40 = vmul.f32 %v3440_v44, %v162_v12 }
  0xfc   :  { %v725_v37 = vsel %vm699_vm7, %v4599_v54, %v724_v63  ;;  %v4600_v33 = vrot.slane %v3776_v13, 6  ;;  %v4601_v56 = vrot.slane %v3964_v11, 1  ;;  %v511_v20 = vmul.f32 %v3442_v45, %v162_v12 }
  0xfd   :  { %v4119_v62 = vadd.f32 %v725_v37, %v666_v59  ;;  %v801_v15 = vadd.f32 %v800_v38, %v785_v41  ;;  %v835_v9 = vadd.f32 %v834_v48, %v819_v18  ;;  %v4602_v10 = vrot.slane %v3968_v55, 2 }
  0xfe   :  { %v627_v43 = vsel %vm616_vm6, %v4600_v33, %v626_v61  ;;  %v214_v21 = vsel %vm201_vm1, %v4601_v56, %v213_v22  ;;  %v462_v31 = vrot.slane %v428_v40, 4  ;;  %v594_v63 = vmul.f32 %v3444_v49, %v162_v12 }
  0xff   :  { %v659_v36 = vadd.f32 %v627_v43, %v576_v47  ;;  %v245_v7 = vadd.f32 %v214_v21, %v140_v0  ;;  %v786_v44 = vmul.f32 0.0, %v4119_v62  ;;  %v297_v13 = vsel %vm284_vm2, %v4602_v10, %v296_v8 }
 0x100   :  { %v4603_v11 = vrot.slane %v3780_v51, 7  ;;  %v836_v45 = vadd.f32 %v835_v9, %v820_v17  ;;  %v380_v41 = vsel %vm367_vm3, %v377_v14, %v379_v6  ;;  %v545_v1 = vrot.slane %v511_v20, 5 }
 0x101   :  { %v328_v52 = vadd.f32 %v297_v13, %v245_v7  ;;  %v802_v47 = vadd.f32 %v801_v15, %v786_v44  ;;  %v821_v55 = vmul.f32 %v786_v44, %v4119_v62  ;;  %v677_v30 = vmul.f32 %v3446_v50, %v162_v12 }
 0x102   :  { %v710_v57 = vsel %vm699_vm7, %v4603_v11, %v709_v28  ;;  %v810_v49 = vmul.f32 %v3720_v39, %v3720_v39  ;;  %v811_v51 = vmul.f32 %v3792_v34, %v3792_v34  ;;  %v787_v3 = vadd.f32 %v3792_v34, %v3720_v39 }
 0x103   :  { %v4144_v53 = vadd.f32 %v710_v57, %v659_v36  ;;  %v411_v17 = vadd.f32 %v380_v41, %v328_v52  ;;  %v837_v25 = vadd.f32 %v836_v45, %v821_v55  ;;  %v463_v14 = vsel %vm450_vm4, %v460_v60, %v462_v31 }
 0x104   :  { %v628_v26 = vrot.slane %v594_v63, 6  ;;  %v812_v50 = vmul.f32 %v3925_v2, %v3925_v2  ;;  %v803_v12 = vrot.slane %v802_v47, 4  ;;  %v778_v18 = vmul.f32 %v3481_v5, %v4077_v23 }
 0x105   :  { %v494_v48 = vadd.f32 %v463_v14, %v411_v17  ;;  %v788_v19 = vadd.f32 %v787_v3, %v3925_v2  ;;  %v546_v59 = vsel %vm533_vm5, %v543_v58, %v545_v1  ;;  %v711_v0 = vrot.slane %v677_v30, 7 }
 0x106   :  { %v838_v22 = vrot.slane %v837_v25, 4  ;;  %v779_v16 = vmul.f32 0.0, %v4144_v53  ;;  %v822_v60 = vadd.f32 %v811_v51, %v810_v49  ;;  %v629_v54 = vsel %vm616_vm6, %v626_v61, %v628_v26 }
 0x107   :  { %v577_v8 = vadd.f32 %v546_v59, %v494_v48  ;;  %v804_v37 = vadd.f32 %v803_v12, %v802_v47  ;;  %v813_v5 = vmul.f32 %v778_v18, %v4077_v23  ;;  %v712_v29 = vsel %vm699_vm7, %v709_v28, %v711_v0  ;;  %v850_v48 = vld [vmem:[%s4518_s2] sm:$0x1]  ;;  %v851_v0 = vld [vmem:[%s4518_s2 + $0x1] sm:$0x1] }
 0x108   :  { %v823_v38 = vadd.f32 %v822_v60, %v812_v50  ;;  %v839_v58 = vadd.f32 %v838_v22, %v837_v25  ;;  %v789_v40 = vadd.f32 %v788_v19, %v778_v18  ;;  %v814_v33 = vmul.f32 %v779_v16, %v4144_v53 }
 0x109   :  { %v660_v6 = vadd.f32 %v629_v54, %v577_v8  ;;  %v805_v56 = vrot.slane %v804_v37, 2 }
 0x10a   :  { %v790_v21 = vadd.f32 %v789_v40, %v779_v16  ;;  %v824_v20 = vadd.f32 %v823_v38, %v813_v5  ;;  %v840_v36 = vrot.slane %v839_v58, 2  ;;  %v4604_v40 = vld [vmem:[#allocation13_spill] sm:$0xff] }
 0x10b   :  { %v743_v43 = vadd.f32 %v712_v29, %v660_v6  ;;  %v806_v7 = vadd.f32 %v805_v56, %v804_v37 }
 0x10c   :  { %v825_v61 = vadd.f32 %v824_v20, %v814_v33  ;;  %v841_v13 = vadd.f32 %v840_v36, %v839_v58 }
 0x10d   :  { %v780_v27 = vmul.f32 0.0, %v743_v43  ;;  %v807_v28 = vrot.slane %v806_v7, 1 }
 0x10e   :  { %v842_v57 = vrot.slane %v841_v13, 1 }
 0x10f   :  { %v791_v15 = vadd.f32 %v790_v21, %v780_v27  ;;  %v815_v9 = vmul.f32 %v780_v27, %v743_v43  ;;  %v808_v41 = vadd.f32 %v807_v28, %v806_v7 }
 0x110   :  { %v843_v1 = vadd.f32 %v842_v57, %v841_v13 }
 0x111   :  { %v792_v44 = vrot.slane %v791_v15, 4  ;;  %v826_v10 = vadd.f32 %v825_v61, %v815_v9 }
 0x113   :  { %v793_v46 = vadd.f32 %v792_v44, %v791_v15  ;;  %v827_v31 = vrot.slane %v826_v10, 4 }
 0x115   :  { %v794_v63 = vrot.slane %v793_v46, 2  ;;  %v828_v11 = vadd.f32 %v827_v31, %v826_v10 }
 0x117   :  { %v795_v45 = vadd.f32 %v794_v63, %v793_v46  ;;  %v829_v52 = vrot.slane %v828_v11, 2 }
 0x119   :  { %v796_v47 = vrot.slane %v795_v45, 1  ;;  %v830_v55 = vadd.f32 %v829_v52, %v828_v11 }
 0x11b   :  { %v797_v30 = vadd.f32 %v796_v47, %v795_v45  ;;  %v831_v49 = vrot.slane %v830_v55, 1 }
 0x11d   :  { %v809_v51 = vadd.f32 %v808_v41, %v797_v30  ;;  %v832_v17 = vadd.f32 %v831_v49, %v830_v55 }
 0x11f   :  { %v844_v3 = vadd.f32 %v843_v1, %v832_v17  ;;  %v845_v25 = vmul.f32 0.02, %v809_v51 }
 0x121   :  { %v846_v14 = vmul.f32 0.02, %v844_v3  ;;  %v847_v26 = vmul.f32 %v845_v25, %v845_v25 }
 0x123   :  { %v848_v50 = vsub.f32 %v846_v14, %v847_v26 }
 0x125   :  { %v849_v12 = vmax.f32 %v848_v50, 0.0 }
 0x127   :  { %v852_v18 = vadd.f32 0.001, %v849_v12 }
 0x129   :  { %3241 = vrsqrt.f32 %v852_v18 }
 0x136   :  { %v3242_v19 = vpop.eup %3241 }
 0x137   :  { %v854_v59 = vmul.f32 %v3242_v19, %v850_v48  ;;  %v3169_v48 = vld [vmem:[#allocation2 + $0x270] ss:$8 sps:$4 sm:$0xff]  }
 0x139   :  { %v855_v22 = vmul.f32 %v854_v59, %v845_v25  ;;  %v860_v16 = vrot.slane %v854_v59, %v3436_v42 }
 0x13b   :  { %v856_v60 = vsub.f32 %v851_v0, %v855_v22  ;;  %v861_v8 = vmul.f32 %v860_v16, %v3720_v39  ;;  %v862_v54 = vmul.f32 %v860_v16, %v3792_v34  ;;  %v863_v37 = vmul.f32 %v860_v16, %v3925_v2 }
 0x13c   :  { %v864_v38 = vmul.f32 %v860_v16, %v4077_v23  ;;  %v865_v6 = vmul.f32 %v860_v16, %v4144_v53  ;;  %v866_v29 = vmul.f32 %v860_v16, %v743_v43  ;;  %v867_v58 = vmul.f32 %v860_v16, %v3784_v32 }
 0x13d   :  { %v4179_v5 = vrot.slane %v856_v60, %v3436_v42  ;;  %v868_v33 = vmul.f32 %v860_v16, %v4604_v40  ;;  %v869_v56 = vmul.f32 %v860_v16, %v4048_v4  ;;  %v870_v39 = vmul.f32 %v860_v16, %v4050_v35 }
 0x13e   :  { %v871_v13 = vmul.f32 %v860_v16, %v4034_v24  ;;  %v872_v63 = vmul.f32 %v860_v16, %v4119_v62 }
 0x13f   :  { %v877_v34 = vadd.f32 %v4179_v5, %v861_v8  ;;  %v878_v2 = vadd.f32 %v4179_v5, %v862_v54  ;;  %v879_v21 = vadd.f32 %v4179_v5, %v863_v37  ;;  %v880_v20 = vadd.f32 %v4179_v5, %v864_v38  ;;  %v3174_v37 = vld [vmem:[#allocation2 + $0x264] ss:$8 sps:$4 sm:$0xff]  }
 0x140   :  { %v881_v23 = vadd.f32 %v4179_v5, %v865_v6  ;;  %v882_v53 = vadd.f32 %v4179_v5, %v866_v29  ;;  %v883_v32 = vadd.f32 %v4179_v5, %v867_v58  ;;  %v884_v43 = vadd.f32 %v4179_v5, %v868_v33 }
 0x141   :  { %v889_v4 = vmax.f32 %v877_v34, 0.0  ;;  %v890_v27 = vmax.f32 %v878_v2, 0.0  ;;  %v891_v35 = vmax.f32 %v879_v21, 0.0  ;;  %v892_v36 = vmax.f32 %v880_v20, 0.0  ;;  %v3172_v34 = vld [vmem:[#allocation2 + $0x260] ss:$8 sps:$4 sm:$0xff]  }
 0x142   :  { %v893_v61 = vmax.f32 %v881_v23, 0.0  ;;  %v894_v15 = vmax.f32 %v882_v53, 0.0  ;;  %v885_v9 = vadd.f32 %v4179_v5, %v869_v56  ;;  %v886_v7 = vadd.f32 %v4179_v5, %v870_v39  ;;  %v3177_v21 = vld [vmem:[#allocation2 + $0x254] ss:$8 sps:$4 sm:$0xff]  }
 0x143   :  { %v4197_v44 = vpack.c.bf16 %v890_v27, %v889_v4  ;;  %v4199_v10 = vpack.c.bf16 %v892_v36, %v891_v35  ;;  %v895_v31 = vmax.f32 %v883_v32, 0.0  ;;  %v896_v28 = vmax.f32 %v884_v43, 0.0 }
 0x144   :  { %v4202_v46 = vpack.c.bf16 %v894_v15, %v893_v61  ;;  %v897_v55 = vmax.f32 %v885_v9, 0.0  ;;  %v898_v24 = vmax.f32 %v886_v7, 0.0  ;;  %v887_v25 = vadd.f32 %v4179_v5, %v871_v13  ;;  %v3175_v61 = vld [vmem:[#allocation2 + $0x250] ss:$8 sps:$4 sm:$0xff]  }
 0x145   :  { %v909_v11 = vshrl.u32 %v4197_v44, 16  ;;  %v911_v57 = vshll.u32 %v4197_v44, 16  ;;  %v916_v45 = vshll.u32 %v4199_v10, 16  ;;  %v920_v52 = vshrl.u32 %v4199_v10, 16 }
 0x146   :  { %v924_v41 = vshll.u32 %v4202_v46, 16  ;;  %v981_v47 = vshrl.u32 %v4202_v46, 16  ;;  %v959_v3 = vrot.slane %v4197_v44, 1  ;;  %v960_v50 = vrot.slane %v4199_v10, 1 }
 0x147   :  { %v913_v1 = vrot.slane %v911_v57, 1  ;;  %v918_v30 = vrot.slane %v916_v45, 1  ;;  %v974_v49 = vrot.slane %v909_v11, 1  ;;  %v975_v51 = vrot.slane %v911_v57, 2 }
 0x148   :  { %v977_v17 = vrot.slane %v920_v52, 1  ;;  %v978_v62 = vrot.slane %v916_v45, 2  ;;  %v983_v12 = vrot.slane %v981_v47, 1  ;;  %v984_v59 = vrot.slane %v924_v41, 2 }
 0x149   :  { %v914_v14 = vor.u32 %v913_v1, %v909_v11  ;;  %v976_v26 = vor.u32 %v975_v51, %v974_v49  ;;  %v922_v19 = vor.u32 %v920_v52, %v918_v30  ;;  %v4214_v0 = vpack.c.bf16 %v896_v28, %v895_v31  ;;  %v3180_v31 = vld [vmem:[#allocation2 + $0x244] ss:$8 sps:$4 sm:$0xff]   ;;  %v3183_v51 = vld [vmem:[#allocation2 + $0x234] ss:$8 sps:$4 sm:$0xff]  }
 0x14a   :  { %v979_v18 = vor.u32 %v978_v62, %v977_v17  ;;  %v926_v16 = vrot.slane %v924_v41, 1  ;;  %v4217_v60 = vpack.c.bf16 %v898_v24, %v897_v55  ;;  %v985_v54 = vor.u32 %v984_v59, %v983_v12  ;;  %v3178_v55 = vld [vmem:[#allocation2 + $0x240] ss:$8 sps:$4 sm:$0xff]   ;;  %v3192_v59 = vld [vmem:[#allocation2 + $0x204] ss:$8 sps:$4 sm:$0xff]  }
 0x14b   :  { %v919_v22 = vsel %vm907_vm8, %v914_v14, %v918_v30  ;;  %v929_v38 = vshrl.u32 %v4214_v0, 16  ;;  %v888_v6 = vadd.f32 %v4179_v5, %v872_v63  ;;  %v961_v29 = vsel %vm201_vm1, %v959_v3, %v960_v50  ;;  %v3181_v14 = vld [vmem:[#allocation2 + $0x230] ss:$8 sps:$4 sm:$0xff]  }
 0x14c   :  { %1531 = vmatprep.mubr.bf16.mxu0 %v919_v22  ;;  %v980_v8 = vsel %vm973_vm9, %v976_v26, %v979_v18  ;;  %v931_v58 = vshll.u32 %v4214_v0, 16  ;;  %v936_v40 = vshll.u32 %v4217_v60, 16  ;;  %v940_v33 = vshrl.u32 %v4217_v60, 16  ;;  %v3190_v22 = vld [vmem:[#allocation2 + $0x200] ss:$8 sps:$4 sm:$0xff]  }
 0x14d   :  { %1604 = vmatprep.mubr.bf16.mxu1 %v980_v8  ;;  %1532 = vmatmul.mubr.bf16.vlgmr.msra.gmra.mxu0 %v4197_v44  ;;  %v927_v56 = vsel %vm907_vm8, %v922_v19, %v926_v16  ;;  %v986_v39 = vsel %vm973_vm9, %v979_v18, %v985_v54  ;;  %v987_v2 = vrot.slane %v929_v38, 1  ;;  %v899_v5 = vmax.f32 %v887_v25, 0.0  ;;  %v3184_v18 = vld [vmem:[#allocation2 + $0x220] ss:$8 sps:$4 sm:$0xff]   ;;  %v3187_v19 = vld [vmem:[#allocation2 + $0x210] ss:$8 sps:$4 sm:$0xff]  }
 0x14e   :  { %1605 = vmatmul.mubr.bf16.vlgmr.msra.gmra.mxu1 %v961_v29  ;;  %1646 = vmatpush1.bf16.msra.mxu0 %v3169_v48  ;;  %v933_v20 = vrot.slane %v931_v58, 1  ;;  %v988_v23 = vrot.slane %v931_v58, 2  ;;  %v990_v53 = vrot.slane %v940_v33, 1  ;;  %v938_v32 = vrot.slane %v936_v40, 1  ;;  %v3189_v48 = vld [vmem:[#allocation2 + $0x214] ss:$8 sps:$4 sm:$0xff]  }
 0x14f   :  { %1541 = vmatprep.mubr.bf16.mxu0 %v927_v56  ;;  %1614 = vmatprep.mubr.bf16.mxu1 %v986_v39  ;;  %v991_v43 = vrot.slane %v936_v40, 2  ;;  %v900_v4 = vmax.f32 %v888_v6, 0.0  ;;  %v962_v27 = vrot.slane %v4202_v46, 1  ;;  %v965_v9 = vrot.slane %v4217_v60, 1  ;;  %v3195_v58 = vld [vmem:[#allocation5 + $0x70] sm:$0xff]   ;;  %v3199_v56 = vld [vmem:[#allocation5 + $0x28] sm:$0xff]  }
 0x150   :  { %1647 = vmatprep.subr.bf16.mxu0 %v3174_v37  ;;  %v934_v35 = vor.u32 %v933_v20, %v929_v38  ;;  %v989_v36 = vor.u32 %v988_v23, %v987_v2  ;;  %v1011_v13 = vrot.slane %v4217_v60, 2  ;;  %v942_v28 = vor.u32 %v940_v33, %v938_v32  ;;  %v3196_v40 = vld [vmem:[#allocation5 + $0x30] sm:$0xff]   ;;  %v3198_v33 = vld [vmem:[#allocation5 + $0xf8] sm:$0xff]   ;;  %v3201_v2 = vld [vmem:[#allocation5 + $0x60] sm:$0xff]  }
 0x151   :  { %v992_v15 = vor.u32 %v991_v43, %v990_v53  ;;  %v906_v7 = vpack.c.bf16 %v900_v4, %v899_v5  ;;  %v963_v45 = vsel %vm201_vm1, %v960_v50, %v962_v27  ;;  %v964_v25 = vrot.slane %v4214_v0, 1  ;;  %v3186_v50 = vld [vmem:[#allocation2 + $0x224] ss:$8 sps:$4 sm:$0xff]   ;;  %v3200_v39 = vld [vmem:[#allocation5 + $0xb8] sm:$0xff]   ;;  %v3202_v5 = vld [vmem:[#allocation5 + $0xf0] sm:$0xff]  }
 0x152   :  { %1648 = vmatpush1.bf16.msra.mxu0 %v3172_v34  ;;  %v939_v52 = vsel %vm907_vm8, %v934_v35, %v938_v32  ;;  %v4605_v16 = vmov 0   ;;  %v1005_v8 = vrot.slane %v4197_v44, 2  ;;  %v1006_v54 = vrot.slane %v4199_v10, 2  ;;  %v3193_v44 = vld [vmem:[#allocation5 + $0x78] sm:$0xff]   ;;  %v3203_v20 = vld [vmem:[#allocation5 + $0x20] sm:$0xff]   ;;  %v3204_v23 = vld [vmem:[#allocation5 + $0xb0] sm:$0xff]  }
 0x153   :  { %1649 = vmatprep.subr.bf16.mxu0 %v3177_v21  ;;  %v944_v63 = vshll.u32 %v906_v7, 16  ;;  %v994_v11 = vshrl.u32 %v906_v7, 16  ;;  %v967_v57 = vrot.slane %v906_v7, 1  ;;  %v993_v41 = vsel %vm973_vm9, %v989_v36, %v992_v15  ;;  %2959 = vmatprep.subr.bf16.mxu1 %v3193_v44  ;;  %v3205_v43 = vld [vmem:[#allocation5 + $0x58] sm:$0xff]   ;;  %v3206_v4 = vld [vmem:[#allocation5 + $0xe8] sm:$0xff]  }
 0x154   :  { %v1013_v47 = vrot.slane %v906_v7, 2  ;;  %v966_v12 = vsel %vm201_vm1, %v964_v25, %v965_v9  ;;  %v1007_v37 = vsel %vm284_vm2, %v1005_v8, %v1006_v54  ;;  %v1008_v38 = vrot.slane %v4202_v46, 2  ;;  %v3197_v46 = vld [vmem:[#allocation5 + $0x68] sm:$0xff]   ;;  %v3207_v36 = vld [vmem:[#allocation5 + $0x18] sm:$0xff]  }
 0x155   :  { %1542 = vmatmul.mubr.bf16.gmra.mxu0 %v4199_v10  ;;  %v946_v24 = vrot.slane %v944_v63, 1  ;;  %v996_v1 = vrot.slane %v994_v11, 1  ;;  %v997_v30 = vrot.slane %v944_v63, 2  ;;  %v968_v49 = vsel %vm201_vm1, %v965_v9, %v967_v57  ;;  %v3194_v10 = vld [vmem:[#allocation5 + $0x38] sm:$0xff]   ;;  %v3210_v9 = vld [vmem:[#allocation5 + $0xe0] sm:$0xff]  }
 0x156   :  { %1615 = vmatmul.mubr.bf16.gmra.mxu1 %v963_v45  ;;  %1650 = vmatpush1.bf16.msra.mxu0 %v3175_v61  ;;  %v1014_v17 = vsel %vm284_vm2, %v1011_v13, %v1013_v47  ;;  %v1010_v6 = vrot.slane %v4214_v0, 2  ;;  %v3208_v61 = vld [vmem:[#allocation5 + $0xa8] sm:$0xff]   ;;  %v3214_v63 = vld [vmem:[#allocation5 + $0xd8] sm:$0xff]   ;;  %v3217_v47 = vld [vmem:[#allocation5 + $0x40] sm:$0xff]  }
 0x157   :  { %1551 = vmatprep.mubr.bf16.mxu0 %v939_v52  ;;  %1624 = vmatprep.mubr.bf16.mxu1 %v993_v41  ;;  %v947_v62 = vsel %vm907_vm8, %v942_v28, %v946_v24  ;;  %v998_v3 = vor.u32 %v997_v30, %v996_v1  ;;  %v3213_v28 = vld [vmem:[#allocation5 + $0x48] sm:$0xff]   ;;  %v3216_v41 = vld [vmem:[#allocation5 + $0x98] sm:$0xff]  }
 0x158   :  { %1651 = vmatprep.subr.bf16.mxu0 %v3180_v31  ;;  %v1012_v29 = vsel %vm284_vm2, %v1010_v6, %v1011_v13  ;;  %2960 = vmatpush3.bf16.msra.mxu1 %v3194_v10  ;;  %v3211_v13 = vld [vmem:[#allocation5 + $0x10] sm:$0xff]   ;;  %v3212_v31 = vld [vmem:[#allocation5 + $0xa0] sm:$0xff]   ;;  %v3215_v52 = vld [vmem:[#allocation5 + $0x8] sm:$0xff]  }
 0x159   :  { %v999_v26 = vsel %vm973_vm9, %v992_v15, %v998_v3  ;;  %2961 = vmatprep.subr.bf16.mxu1 %v3195_v58  ;;  %v3209_v15 = vld [vmem:[#allocation5 + $0x50] sm:$0xff]   ;;  %v4606_v6 = vld [vmem:[#allocation11_spill] sm:$0xff] }
 0x15a   :  { %1652 = vmatpush1.bf16.msra.mxu0 %v3178_v55  ;;  %v3218_v55 = vld [vmem:[#allocation5 + $0xd0] sm:$0xff]  }
 0x15b   :  { %1653 = vmatprep.subr.bf16.mxu0 %v3183_v51  ;;  %v3220_v51 = vld [vmem:[#allocation5 + $0x90] sm:$0xff]  }
 0x15c   :  { %2962 = vmatpush3.bf16.msra.mxu1 %v3196_v40 }
 0x15d   :  { %1552 = vmatmul.mubr.bf16.gmra.mxu0 %v4214_v0  ;;  %2963 = vmatprep.subr.bf16.mxu1 %v3197_v46 }
 0x15e   :  { %1625 = vmatmul.mubr.bf16.gmra.mxu1 %v966_v12  ;;  %1654 = vmatpush1.bf16.msra.mxu0 %v3181_v14 }
 0x15f   :  { %1561 = vmatprep.mubr.bf16.mxu0 %v947_v62  ;;  %1634 = vmatprep.mubr.bf16.mxu1 %v999_v26  ;;  %v3222_v62 = vld [vmem:[#allocation5 + $0x178] sm:$0xff]   ;;  %v3223_v26 = vld [vmem:[#allocation5 + $0x88] sm:$0xff]  }
 0x160   :  { %1655 = vmatprep.subr.bf16.mxu0 %v3186_v50  ;;  %2964 = vmatpush3.bf16.msra.mxu1 %v3199_v56  ;;  %v3225_v50 = vld [vmem:[#allocation5 + $0xc0] sm:$0xff]  }
 0x161   :  { %2965 = vmatprep.subr.bf16.mxu1 %v3201_v2 }
 0x162   :  { %1656 = vmatpush1.bf16.msra.mxu0 %v3184_v18 }
 0x163   :  { %1657 = vmatprep.subr.bf16.mxu0 %v3189_v48 }
 0x164   :  { %2966 = vmatpush3.bf16.msra.mxu1 %v3203_v20  ;;  %v4607_v20 = vmov 0.0  }
 0x165   :  { %1562 = vmatmul.mubr.bf16.gmra.mxu0 %v4217_v60  ;;  %v1009_v60 = vsel %vm284_vm2, %v1006_v54, %v1008_v38  ;;  %2967 = vmatprep.subr.bf16.mxu1 %v3205_v43 }
 0x166   :  { %1635 = vmatmul.mubr.bf16.gmra.mxu1 %v968_v49  ;;  %1658 = vmatpush1.bf16.msra.mxu0 %v3187_v19  ;;  %v3219_v49 = vld [vmem:[#allocation5] sm:$0xff]  }
 0x167   :  { %1659 = vmatprep.subr.bf16.mxu0 %v3192_v59  ;;  %1677 = vmatprep.mubr.bf16.mxu0 %v4605_v16  ;;  %v3227_v19 = vld [vmem:[#allocation5 + $0x80] sm:$0xff]  }
 0x168   :  { %2968 = vmatpush3.bf16.msra.mxu1 %v3207_v36 }
 0x169   :  { %2969 = vmatprep.subr.bf16.mxu1 %v3209_v15 }
 0x16a   :  { %1660 = vmatpush1.bf16.msra.mxu0 %v3190_v22 }
 0x16b   :  { %2993 = vmatprep.subr.bf16.mxu0 %v3198_v33 }
 0x16c   :  { %2970 = vmatpush3.bf16.msra.mxu1 %v3211_v13 }
 0x16d   :  { %1678 = vmatmul.mubr.bf16.vlgmr.msra.gmra.mxu0 %v1007_v37  ;;  %2971 = vmatprep.subr.bf16.mxu1 %v3213_v28 }
 0x16e   :  { %1687 = vmatprep.mubr.bf16.mxu0 %v4605_v16  ;;  %2994 = vmatpush3.bf16.msra.mxu0 %v3200_v39 }
 0x16f   :  { %2995 = vmatprep.subr.bf16.mxu0 %v3202_v5 }
 0x170   :  { %2972 = vmatpush3.bf16.msra.mxu1 %v3215_v52 }
 0x171   :  { %2973 = vmatprep.subr.bf16.mxu1 %v3217_v47 }
 0x172   :  { %2996 = vmatpush3.bf16.msra.mxu0 %v3204_v23 }
 0x173   :  { %2997 = vmatprep.subr.bf16.mxu0 %v3206_v4 }
 0x174   :  { %2974 = vmatpush3.bf16.msra.mxu1 %v3219_v49 }
 0x175   :  { %1688 = vmatmul.mubr.bf16.gmra.mxu0 %v1009_v60  ;;  %3027 = vmatprep.subr.bf16.mxu1 %v3222_v62 }
 0x176   :  { %1697 = vmatprep.mubr.bf16.mxu0 %v4605_v16  ;;  %2998 = vmatpush3.bf16.msra.mxu0 %v3208_v61 }
 0x177   :  { %2999 = vmatprep.subr.bf16.mxu0 %v3210_v9 }
 0x17a   :  { %3000 = vmatpush3.bf16.msra.mxu0 %v3212_v31 }
 0x17b   :  { %3001 = vmatprep.subr.bf16.mxu0 %v3214_v63 }
 0x17d   :  { %1698 = vmatmul.mubr.bf16.gmra.mxu0 %v1012_v29  ;;  %v4288_v29 = vadd.s32 16, %v4606_v6 }
 0x17e   :  { %1707 = vmatprep.mubr.bf16.mxu0 %v4605_v16  ;;  %3002 = vmatpush3.bf16.msra.mxu0 %v3216_v41 }
 0x17f   :  { %3003 = vmatprep.subr.bf16.mxu0 %v3218_v55  ;;  %vm1720_vm10 = vcmp.lt.s32.totalorder %v4288_v29, 21  ;;  %vm2682_vm11 = vcmp.lt.s32.totalorder %v4288_v29, 19 }
 0x180   :  { %v4297_v23 = vsel %vm1720_vm10, 1.0, %v4607_v20 }
 0x182   :  { %3004 = vmatpush3.bf16.msra.mxu0 %v3220_v51 }
 0x185   :  { %1708 = vmatmul.mubr.bf16.gmra.mxu0 %v1014_v17  ;;  %v3221_v17 = vld [vmem:[#allocation5 + $0xc8] sm:$0xff]  }
 0x186   :  { %3005 = vmatprep.subr.bf16.mxu0 %v3221_v17 }
 0x187   :  { %3006 = vmatpush3.bf16.msra.mxu0 %v3223_v26 }
 0x188   :  { %3007 = vmatprep.subr.bf16.mxu0 %v3225_v50 }
 0x18b   :  { %3008 = vmatpush3.bf16.msra.mxu0 %v3227_v19 }
 0x20d   :  { %v4255_v0 = vpop.f32.mrf.mxu0 }
 0x20e   :  { %v4257_v34 = vpop.f32.mrf.mxu1 }
 0x20f   :  { %v4259_v21 = vpop.f32.mrf.mxu0  ;;  %v1607_v4 = vadd.f32 %v4257_v34, %v4255_v0 }
 0x210   :  { %v4261_v53 = vpop.f32.mrf.mxu1 }
 0x211   :  { %v4263_v32 = vpop.f32.mrf.mxu0 }
 0x212   :  { %v4265_v27 = vpop.f32.mrf.mxu1 }
 0x213   :  { %v4267_v35 = vpop.f32.mrf.mxu0  ;;  %v1611_v33 = vadd.f32 %v4265_v27, %v4263_v32  ;;  %v1609_v32 = vadd.f32 %v4261_v53, %v4259_v21 }
 0x214   :  { %v1612_v11 = vpop.f32.mrf.mxu1 }
 0x215   :  { %v1543_v7 = vpop.f32.mrf.mxu0  ;;  %v1613_v2 = vadd.f32 %v1612_v11, %v4267_v35 }
 0x216   :  { %v1616_v24 = vpop.f32.mrf.mxu1 }
 0x217   :  { %v1545_v57 = vpop.f32.mrf.mxu0  ;;  %v1617_v40 = vadd.f32 %v1616_v24, %v1543_v7 }
 0x218   :  { %v1618_v3 = vpop.f32.mrf.mxu1 }
 0x219   :  { %v1547_v45 = vpop.f32.mrf.mxu0  ;;  %v1619_v56 = vadd.f32 %v1618_v3, %v1545_v57 }
 0x21a   :  { %v1620_v12 = vpop.f32.mrf.mxu1 }
 0x21b   :  { %v1549_v1 = vpop.f32.mrf.mxu0  ;;  %v1621_v36 = vadd.f32 %v1620_v12, %v1547_v45 }
 0x21c   :  { %v1622_v59 = vpop.f32.mrf.mxu1 }
 0x21d   :  { %v4269_v30 = vpop.f32.mrf.mxu0  ;;  %v1623_v31 = vadd.f32 %v1622_v59, %v1549_v1 }
 0x21e   :  { %v4283_v8 = vpop.f32.mrf.mxu1 }
 0x21f   :  { %v4271_v25 = vpop.f32.mrf.mxu0 }
 0x220   :  { %v1628_v38 = vpop.f32.mrf.mxu1 }
 0x221   :  { %v4273_v14 = vpop.f32.mrf.mxu0 }
 0x222   :  { %v1630_v10 = vpop.f32.mrf.mxu1 }
 0x223   :  { %v4275_v18 = vpop.f32.mrf.mxu0 }
 0x224   :  { %v1632_v5 = vpop.f32.mrf.mxu1 }
 0x225   :  { %v4277_v48 = vpop.f32.mrf.mxu0 }
 0x226   :  { %v1636_v0 = vpop.f32.mrf.mxu1 }
 0x227   :  { %v4279_v22 = vpop.f32.mrf.mxu0 }
 0x228   :  { %v1638_v55 = vpop.f32.mrf.mxu1 }
 0x229   :  { %v4281_v16 = vpop.f32.mrf.mxu0 }
 0x22b   :  { %v4285_v54 = vpop.f32.mrf.mxu0 }
 0x22d   :  { %v1679_v37 = vpop.f32.mrf.mxu0 }
 0x22e   :  { %v4309_v35 = vadd.f32 %v1679_v37, %v1607_v4  ;;  %v1637_v4 = vadd.f32 %v1636_v0, %v4277_v48 }
 0x22f   :  { %v1681_v60 = vpop.f32.mrf.mxu0 }
 0x230   :  { %v4315_v34 = vadd.f32 %v1681_v60, %v1609_v32  ;;  %v1784_v52 = vmul.f32 %v4309_v35, %v4309_v35  ;;  %v1639_v32 = vadd.f32 %v1638_v55, %v4279_v22 }
 0x231   :  { %v1683_v44 = vpop.f32.mrf.mxu0 }
 0x232   :  { %v4301_v61 = vadd.f32 %v1683_v44, %v1611_v33  ;;  %v1785_v24 = vmul.f32 %v4315_v34, %v4315_v34  ;;  %v1631_v44 = vadd.f32 %v1630_v10, %v4273_v14 }
 0x233   :  { %v1685_v58 = vpop.f32.mrf.mxu0 }
 0x234   :  { %v4307_v27 = vadd.f32 %v1685_v58, %v1613_v2  ;;  %v1786_v21 = vmul.f32 %v4301_v61, %v4301_v61  ;;  %v1746_v41 = vadd.f32 %v4301_v61, %v4309_v35  ;;  %v1633_v58 = vadd.f32 %v1632_v5, %v4275_v18 }
 0x235   :  { %v1689_v46 = vpop.f32.mrf.mxu0  ;;  %v1627_v2 = vadd.f32 %v4283_v8, %v4269_v30 }
 0x236   :  { %v4293_v39 = vadd.f32 %v1689_v46, %v1617_v40  ;;  %v1787_v11 = vmul.f32 %v4307_v27, %v4307_v27  ;;  %v1755_v1 = vadd.f32 %v4307_v27, %v4315_v34  ;;  %v1800_v62 = vadd.f32 %v1786_v21, %v1784_v52  ;;  %v1640_v40 = vpop.f32.mrf.mxu1 }
 0x237   :  { %v1691_v43 = vpop.f32.mrf.mxu0  ;;  %v1641_v0 = vadd.f32 %v1640_v40, %v4281_v16 }
 0x238   :  { %v4303_v15 = vadd.f32 %v1691_v43, %v1619_v56  ;;  %v1734_v7 = vmul.f32 %v4297_v23, %v4293_v39  ;;  %v1809_v50 = vadd.f32 %v1787_v11, %v1785_v24  ;;  %v1629_v43 = vadd.f32 %v1628_v38, %v4271_v25  ;;  %v1642_v30 = vpop.f32.mrf.mxu1 }
 0x239   :  { %v1693_v9 = vpop.f32.mrf.mxu0 }
 0x23a   :  { %v4313_v13 = vadd.f32 %v1693_v9, %v1621_v36  ;;  %v1735_v28 = vmul.f32 %v4297_v23, %v4303_v15  ;;  %v1788_v47 = vmul.f32 %v1734_v7, %v4293_v39  ;;  %v1747_v3 = vadd.f32 %v1746_v41, %v1734_v7 }
 0x23b   :  { %v1695_v63 = vpop.f32.mrf.mxu0 }
 0x23c   :  { %v1736_v53 = vmul.f32 0.0, %v4313_v13  ;;  %v4324_v57 = vadd.f32 %v1695_v63, %v1623_v31  ;;  %v1789_v49 = vmul.f32 %v1735_v28, %v4303_v15  ;;  %v1756_v12 = vadd.f32 %v1755_v1, %v1735_v28 }
 0x23d   :  { %v1699_v45 = vpop.f32.mrf.mxu0  ;;  %v1801_v37 = vadd.f32 %v1800_v62, %v1788_v47 }
 0x23e   :  { %v1737_v51 = vmul.f32 0.0, %v4324_v57  ;;  %v1790_v26 = vmul.f32 %v1736_v53, %v4313_v13  ;;  %v1748_v60 = vadd.f32 %v1747_v3, %v1736_v53  ;;  %v1810_v46 = vadd.f32 %v1809_v50, %v1789_v49 }
 0x23f   :  { %v1701_v17 = vpop.f32.mrf.mxu0  ;;  %v4350_v5 = vadd.f32 %v1699_v45, %v1627_v2  ;;  %v1643_v45 = vadd.f32 %v1642_v30, %v4285_v54 }
 0x240   :  { %v1791_v19 = vmul.f32 %v1737_v51, %v4324_v57  ;;  %v1757_v33 = vadd.f32 %v1756_v12, %v1737_v51  ;;  %v1802_v36 = vadd.f32 %v1801_v37, %v1790_v26  ;;  %v1749_v10 = vrot.slane %v1748_v60, 4 }
 0x241   :  { %v1703_v59 = vpop.f32.mrf.mxu0  ;;  %v4352_v31 = vadd.f32 %v1701_v17, %v1629_v43  ;;  %v1792_v41 = vmul.f32 %v4350_v5, %v4350_v5 }
 0x242   :  { %v1811_v9 = vadd.f32 %v1810_v46, %v1791_v19  ;;  %v4346_v7 = vadd.f32 %v1703_v59, %v1631_v44  ;;  %v1758_v25 = vrot.slane %v1757_v33, 4  ;;  %v1803_v48 = vrot.slane %v1802_v36, 4 }
 0x243   :  { %v1705_v56 = vpop.f32.mrf.mxu0  ;;  %v1750_v52 = vadd.f32 %v1749_v10, %v1748_v60  ;;  %v1793_v47 = vmul.f32 %v4352_v31, %v4352_v31 }
 0x244   :  { %v4348_v14 = vadd.f32 %v1705_v56, %v1633_v58  ;;  %v1812_v63 = vrot.slane %v1811_v9, 4  ;;  %v1794_v21 = vmul.f32 %v4346_v7, %v4346_v7  ;;  %v1759_v55 = vadd.f32 %v1758_v25, %v1757_v33 }
 0x245   :  { %v1709_v18 = vpop.f32.mrf.mxu0  ;;  %v1804_v51 = vadd.f32 %v1803_v48, %v1802_v36  ;;  %v1764_v54 = vadd.f32 %v4346_v7, %v4350_v5  ;;  %v1751_v60 = vrot.slane %v1750_v52, 2 }
 0x246   :  { %v4354_v28 = vadd.f32 %v1709_v18, %v1637_v4  ;;  %v1795_v53 = vmul.f32 %v4348_v14, %v4348_v14  ;;  %v1773_v17 = vadd.f32 %v4348_v14, %v4352_v31  ;;  %v1813_v3 = vadd.f32 %v1812_v63, %v1811_v9 }
 0x247   :  { %v1711_v8 = vpop.f32.mrf.mxu0  ;;  %v1818_v26 = vadd.f32 %v1794_v21, %v1792_v41  ;;  %v1760_v44 = vrot.slane %v1759_v55, 2  ;;  %v1805_v43 = vrot.slane %v1804_v51, 2  ;;  %v1752_v10 = vadd.f32 %v1751_v60, %v1750_v52 }
 0x248   :  { %v1742_v22 = vmul.f32 %v4297_v23, %v4354_v28  ;;  %v4358_v38 = vadd.f32 %v1711_v8, %v1639_v32  ;;  %v1827_v50 = vadd.f32 %v1795_v53, %v1793_v47  ;;  %v1814_v4 = vrot.slane %v1813_v3, 2 }
 0x249   :  { %v1713_v11 = vpop.f32.mrf.mxu0  ;;  %v1761_v30 = vadd.f32 %v1760_v44, %v1759_v55  ;;  %v1753_v41 = vrot.slane %v1752_v10, 1 }
 0x24a   :  { %v1796_v16 = vmul.f32 %v1742_v22, %v4354_v28  ;;  %v1743_v24 = vmul.f32 %v4297_v23, %v4358_v38  ;;  %v4373_v1 = vadd.f32 %v1713_v11, %v1641_v0  ;;  %v1765_v19 = vadd.f32 %v1764_v54, %v1742_v22 }
 0x24b   :  { %v1715_v49 = vpop.f32.mrf.mxu0  ;;  %v1806_v0 = vadd.f32 %v1805_v43, %v1804_v51  ;;  %v1815_v63 = vadd.f32 %v1814_v4, %v1813_v3  ;;  %v1762_v47 = vrot.slane %v1761_v30, 1 }
 0x24c   :  { %v4379_v62 = vadd.f32 %v1715_v49, %v1643_v45  ;;  %v1797_v12 = vmul.f32 %v1743_v24, %v4358_v38  ;;  %v1774_v59 = vadd.f32 %v1773_v17, %v1743_v24  ;;  %v1744_v23 = vmul.f32 0.0, %v4373_v1 }
 0x24d   :  { %v1819_v58 = vadd.f32 %v1818_v26, %v1796_v16  ;;  %v1807_v17 = vrot.slane %v1806_v0, 1  ;;  %v1816_v26 = vrot.slane %v1815_v63, 1 }
 0x24e   :  { %v1745_v37 = vmul.f32 0.0, %v4379_v62  ;;  %v1828_v40 = vadd.f32 %v1827_v50, %v1797_v12  ;;  %v1766_v46 = vadd.f32 %v1765_v19, %v1744_v23  ;;  %v1798_v33 = vmul.f32 %v1744_v23, %v4373_v1 }
 0x24f   :  { %v1754_v19 = vadd.f32 %v1753_v41, %v1752_v10  ;;  %v1808_v60 = vadd.f32 %v1807_v17, %v1806_v0  ;;  %v1817_v44 = vadd.f32 %v1816_v26, %v1815_v63  ;;  %v3323_v0 = vmov 1966171168   ;;  %v4608_v17 = vld [vmem:[#allocation12_spill] sm:$0xff] }
 0x250   :  { %v1775_v56 = vadd.f32 %v1774_v59, %v1745_v37  ;;  %v1799_v2 = vmul.f32 %v1745_v37, %v4379_v62  ;;  %v1767_v36 = vrot.slane %v1766_v46, 4  ;;  %v1820_v32 = vadd.f32 %v1819_v58, %v1798_v33 }
 0x251   :  { %v1763_v59 = vadd.f32 %v1762_v47, %v1761_v30  ;;  %v1859_v63 = vunpack.c.l.s4 %v3323_v0 }
 0x252   :  { %v1776_v9 = vrot.slane %v1775_v56, 4  ;;  %v1829_v18 = vadd.f32 %v1828_v40, %v1799_v2  ;;  %v1768_v25 = vadd.f32 %v1767_v36, %v1766_v46  ;;  %v1821_v8 = vrot.slane %v1820_v32, 4 }
 0x254   :  { %v1777_v48 = vadd.f32 %v1776_v9, %v1775_v56  ;;  %v1830_v22 = vrot.slane %v1829_v18, 4  ;;  %v1769_v21 = vrot.slane %v1768_v25, 2  ;;  %v1822_v53 = vadd.f32 %v1821_v8, %v1820_v32 }
 0x256   :  { %v1778_v11 = vrot.slane %v1777_v48, 2  ;;  %v1831_v45 = vadd.f32 %v1830_v22, %v1829_v18  ;;  %v1770_v16 = vadd.f32 %v1769_v21, %v1768_v25  ;;  %v1823_v24 = vrot.slane %v1822_v53, 2 }
 0x257   :  { %v1860_v21 = vunpack.c.0.s8 %v1859_v63 }
 0x258   :  { %v1779_v49 = vadd.f32 %v1778_v11, %v1777_v48  ;;  %v1832_v54 = vrot.slane %v1831_v45, 2  ;;  %v1771_v52 = vrot.slane %v1770_v16, 1  ;;  %v1824_v55 = vadd.f32 %v1823_v24, %v1822_v53 }
 0x259   :  { %v1863_v11 = vsub.s32 %v1860_v21, %v4606_v6  ;;  %v2901_v6 = vld [vmem:[%s4520_s4 + $0x1] ss:$2 sm:$0x3]  ;;  %v3226_v21 = vld [vmem:[#allocation5 + $0x170] sm:$0xff]  }
 0x25a   :  { %v1780_v50 = vrot.slane %v1779_v49, 1  ;;  %v1833_v12 = vadd.f32 %v1832_v54, %v1831_v45  ;;  %v1772_v51 = vadd.f32 %v1771_v52, %v1770_v16  ;;  %v1825_v3 = vrot.slane %v1824_v55, 1  ;;  %v1848_v16 = vld [vmem:[%s4520_s4] ss:$2 sm:$0x3] }
 0x25c   :  { %v1781_v23 = vadd.f32 %v1780_v50, %v1779_v49  ;;  %v1834_v37 = vrot.slane %v1833_v12, 1  ;;  %v1782_v58 = vadd.f32 %v1772_v51, %v1754_v19  ;;  %v1826_v40 = vadd.f32 %v1825_v3, %v1824_v55 }
 0x25e   :  { %v1783_v46 = vadd.f32 %v1781_v23, %v1763_v59  ;;  %v1835_v33 = vadd.f32 %v1834_v37, %v1833_v12  ;;  %v1836_v56 = vadd.f32 %v1826_v40, %v1808_v60  ;;  %v1838_v2 = vmul.f32 0.023809524, %v1782_v58 }
 0x260   :  { %v1837_v43 = vadd.f32 %v1835_v33, %v1817_v44  ;;  %v1839_v4 = vmul.f32 0.023809524, %v1783_v46  ;;  %v1840_v36 = vmul.f32 0.023809524, %v1836_v56  ;;  %v1842_v32 = vmul.f32 %v1838_v2, %v1838_v2 }
 0x262   :  { %v1841_v9 = vmul.f32 0.023809524, %v1837_v43  ;;  %v1843_v18 = vmul.f32 %v1839_v4, %v1839_v4  ;;  %v1844_v10 = vsub.f32 %v1840_v36, %v1842_v32 }
 0x264   :  { %v1845_v30 = vsub.f32 %v1841_v9, %v1843_v18  ;;  %v1846_v25 = vmax.f32 %v1844_v10, 0.0 }
 0x266   :  { %v1847_v8 = vmax.f32 %v1845_v30, 0.0  ;;  %v1851_v48 = vadd.f32 0.001, %v1846_v25  ;;  %v3224_v25 = vld [vmem:[#allocation5 + $0x138] sm:$0xff]  }
 0x268   :  { %v1852_v22 = vadd.f32 0.001, %v1847_v8  ;;  %3243 = vrsqrt.f32 %v1851_v48 }
 0x26a   :  { %3245 = vrsqrt.f32 %v1852_v22 }
 0x275   :  { %v3244_v53 = vpop.eup %3243 }
 0x277   :  { %v3246_v45 = vpop.eup %3245 }
 0x278   :  { %v1857_v41 = vcombine.low %v3244_v53, %v3246_v45 }
 0x27a   :  { %v1864_v47 = vrot.slane %v1857_v41, %v1863_v11 }
 0x27c   :  { %v1871_v24 = vrot.slane %v1864_v47, %v1863_v11 }
 0x27e   :  { %v1873_v49 = vmul.f32 %v1871_v24, %v1848_v16 }
 0x280   :  { %v1878_v54 = vrot.slane %v1873_v49, %v3436_v42  ;;  %v1882_v26 = vrot.slane %v1873_v49, %v4608_v17 }
 0x282   :  { %v1885_v52 = vmul.f32 %v1878_v54, %v1838_v2  ;;  %v1886_v55 = vmul.f32 %v1882_v26, %v1839_v4  ;;  %v1919_v59 = vmul.f32 %v1882_v26, %v4358_v38  ;;  %v1921_v51 = vmul.f32 %v1882_v26, %v4379_v62 }
 0x283   :  { %v1907_v23 = vmul.f32 %v1882_v26, %v4315_v34  ;;  %v1909_v37 = vmul.f32 %v1882_v26, %v4307_v27  ;;  %v1906_v60 = vmul.f32 %v1878_v54, %v4309_v35  ;;  %v1908_v44 = vmul.f32 %v1878_v54, %v4301_v61 }
 0x284   :  { %v1889_v50 = vcombine.low %v1885_v52, %v1886_v55  ;;  %v1911_v58 = vmul.f32 %v1882_v26, %v4303_v15  ;;  %v1913_v40 = vmul.f32 %v1882_v26, %v4324_v57  ;;  %v1915_v46 = vmul.f32 %v1882_v26, %v4352_v31 }
 0x285   :  { %v1917_v62 = vmul.f32 %v1882_v26, %v4348_v14  ;;  %v1910_v34 = vmul.f32 %v1878_v54, %v4293_v39  ;;  %v1912_v27 = vmul.f32 %v1878_v54, %v4313_v13  ;;  %v1914_v35 = vmul.f32 %v1878_v54, %v4350_v5  ;;  %v3228_v26 = vld [vmem:[#allocation5 + $0x130] sm:$0xff]  }
 0x286   :  { %v1896_v12 = vrot.slane %v1889_v50, %v1863_v11  ;;  %v1916_v61 = vmul.f32 %v1878_v54, %v4346_v7  ;;  %v4414_v15 = vmul.f32 %v1878_v54, %v4354_v28  ;;  %v1920_v47 = vmul.f32 %v1878_v54, %v4373_v1  ;;  %v3229_v54 = vld [vmem:[#allocation5 + $0x168] sm:$0xff]  }
 0x288   :  { %v1903_v19 = vrot.slane %v1896_v12, %v1863_v11 }
 0x28a   :  { %v1905_v3 = vsub.f32 %v2901_v6, %v1903_v19 }
 0x28c   :  { %v4405_v33 = vrot.slane %v1905_v3, %v3436_v42  ;;  %v1930_v38 = vrot.slane %v1905_v3, %v4608_v17 }
 0x28e   :  { %v1946_v57 = vadd.f32 %v1930_v38, %v1919_v59  ;;  %v1948_v31 = vadd.f32 %v1930_v38, %v1921_v51  ;;  %v1934_v56 = vadd.f32 %v1930_v38, %v1907_v23  ;;  %v1936_v2 = vadd.f32 %v1930_v38, %v1909_v37 }
 0x28f   :  { %v1933_v43 = vadd.f32 %v4405_v33, %v1906_v60  ;;  %v1935_v4 = vadd.f32 %v4405_v33, %v1908_v44  ;;  %v1938_v14 = vadd.f32 %v1930_v38, %v1911_v58  ;;  %v1940_v36 = vadd.f32 %v1930_v38, %v1913_v40 }
 0x290   :  { %v1962_v39 = vmax.f32 %v1946_v57, 0.0  ;;  %v1964_v32 = vmax.f32 %v1948_v31, 0.0  ;;  %v1950_v13 = vmax.f32 %v1934_v56, 0.0  ;;  %v1952_v9 = vmax.f32 %v1936_v2, 0.0  ;;  %v3231_v56 = vld [vmem:[#allocation5 + $0x160] sm:$0xff]  }
 0x291   :  { %v1949_v5 = vmax.f32 %v1933_v43, 0.0  ;;  %v1951_v18 = vmax.f32 %v1935_v4, 0.0  ;;  %v1942_v7 = vadd.f32 %v1930_v38, %v1915_v46  ;;  %v1944_v10 = vadd.f32 %v1930_v38, %v1917_v62 }
 0x292   :  { %v4418_v28 = vpack.c.bf16 %v1964_v32, %v1962_v39  ;;  %v4420_v30 = vpack.c.bf16 %v1952_v9, %v1950_v13  ;;  %v1954_v8 = vmax.f32 %v1938_v14, 0.0  ;;  %v1956_v48 = vmax.f32 %v1940_v36, 0.0 }
 0x293   :  { %v4422_v22 = vpack.c.bf16 %v1951_v18, %v1949_v5  ;;  %v1958_v0 = vmax.f32 %v1942_v7, 0.0  ;;  %v1960_v63 = vmax.f32 %v1944_v10, 0.0  ;;  %v1937_v53 = vadd.f32 %v4405_v33, %v1910_v34  ;;  %v3232_v5 = vld [vmem:[#allocation5 + $0x120] sm:$0xff]  }
 0x294   :  { %2541 = vmatprep.mubr.bf16.mxu1 %v4420_v30  ;;  %v4426_v11 = vpack.c.bf16 %v1956_v48, %v1954_v8  ;;  %v1988_v45 = vshll.u32 %v4420_v30, 16  ;;  %v1939_v41 = vadd.f32 %v4405_v33, %v1912_v27  ;;  %v1986_v49 = vshrl.u32 %v4420_v30, 16  ;;  %v3230_v27 = vld [vmem:[#allocation5 + $0x128] sm:$0xff]  }
 0x295   :  { %2542 = vmatmul.mubr.bf16.vlgmr.msra.gmra.mxu1 %v4422_v22  ;;  %v4432_v16 = vpack.c.bf16 %v1960_v63, %v1958_v0  ;;  %v2958_v24 = vpack.c.bf16 %v1958_v0, %v1954_v8  ;;  %v1953_v17 = vmax.f32 %v1937_v53, 0.0  ;;  %v1976_v12 = vshll.u32 %v4422_v22, 16  ;;  %v3233_v8 = vld [vmem:[#allocation5 + $0x158] sm:$0xff]  }
 0x296   :  { %3028 = vmatpush3.bf16.msra.mxu1 %v3224_v25  ;;  %v1990_v52 = vrot.slane %v1988_v45, 1  ;;  %v1993_v55 = vshll.u32 %v4426_v11, 16  ;;  %v1955_v50 = vmax.f32 %v1939_v41, 0.0  ;;  %v1974_v1 = vshrl.u32 %v4422_v22, 16 }
 0x297   :  { %2549 = vmatprep.mubr.bf16.mxu1 %v2958_v24  ;;  %3029 = vmatprep.subr.bf16.mxu1 %v3226_v21  ;;  %v1941_v6 = vadd.f32 %v4405_v33, %v1914_v35  ;;  %v1943_v19 = vadd.f32 %v4405_v33, %v1916_v61  ;;  %v2000_v59 = vshrl.u32 %v4426_v11, 16  ;;  %v1978_v37 = vrot.slane %v1976_v12, 1 }
 0x298   :  { %v1991_v51 = vor.u32 %v1990_v52, %v1986_v49  ;;  %v1995_v3 = vrot.slane %v1993_v55, 1  ;;  %v4441_v23 = vpack.c.bf16 %v1955_v50, %v1953_v17  ;;  %v2018_v58 = vshll.u32 %v4432_v16, 16  ;;  %v3234_v49 = vld [vmem:[#allocation5 + $0x118] sm:$0xff]  }
 0x299   :  { %v1957_v60 = vmax.f32 %v1941_v6, 0.0  ;;  %v1959_v44 = vmax.f32 %v1943_v19, 0.0  ;;  %v2023_v40 = vshll.u32 %v4418_v28, 16  ;;  %v1979_v38 = vor.u32 %v1978_v37, %v1974_v1 }
 0x29a   :  { %3030 = vmatpush3.bf16.msra.mxu1 %v3228_v26  ;;  %v1996_v46 = vsel %vm907_vm8, %v1991_v51, %v1995_v3  ;;  %v1981_v62 = vshll.u32 %v4441_v23, 16  ;;  %v2016_v34 = vshrl.u32 %v4432_v16, 16  ;;  %v2002_v57 = vor.u32 %v2000_v59, %v1995_v3  ;;  %v3236_v59 = vld [vmem:[#allocation5 + $0x110] sm:$0xff]  }
 0x29b   :  { %2598 = vmatprep.mubr.bf16.mxu0 %v1996_v46  ;;  %3031 = vmatprep.subr.bf16.mxu1 %v3229_v54  ;;  %v4448_v35 = vpack.c.bf16 %v1959_v44, %v1957_v60  ;;  %v2957_v61 = vpack.c.bf16 %v1957_v60, %v1953_v17  ;;  %v2020_v31 = vrot.slane %v2018_v58, 1  ;;  %v2078_v43 = vunpack.c.h.b16 %v4432_v16  ;;  %v3237_v60 = vld [vmem:[#allocation5 + $0x148] sm:$0xff]  }
 0x29c   :  { %v1983_v2 = vrot.slane %v1981_v62, 1  ;;  %v2084_v4 = vunpack.c.l.b16 %v4418_v28  ;;  %v1945_v14 = vadd.f32 %v4405_v33, %v4414_v15  ;;  %v2025_v39 = vrot.slane %v2023_v40, 1  ;;  %v3239_v62 = vld [vmem:[#allocation5 + $0x140] sm:$0xff]  }
 0x29d   :  { %2550 = vmatmul.mubr.bf16.gmra.mxu1 %v2957_v61  ;;  %v2021_v36 = vor.u32 %v2020_v31, %v2016_v34  ;;  %v1947_v32 = vadd.f32 %v4405_v33, %v1920_v47  ;;  %v2006_v7 = vshll.u32 %v4448_v35, 16  ;;  %v2004_v48 = vshrl.u32 %v4448_v35, 16  ;;  %v3240_v61 = vld [vmem:[#allocation5 + $0x100] sm:$0xff]  }
 0x29e   :  { %v1984_v13 = vsel %vm907_vm8, %v1979_v38, %v1983_v2  ;;  %3032 = vmatpush3.bf16.msra.mxu1 %v3230_v27  ;;  %v2198_v9 = vpack.c.b16 %v2084_v4, %v2078_v43  ;;  %v1961_v18 = vmax.f32 %v1945_v14, 0.0  ;;  %v2030_v33 = vshrl.u32 %v4418_v28, 16  ;;  %v3238_v38 = vld [vmem:[#allocation5 + $0x108] sm:$0xff]  }
 0x29f   :  { %2599 = vmatmul.mubr.bf16.vlgmr.msra.gmra.mxu0 %v1984_v13  ;;  %v2026_v10 = vsel %vm907_vm8, %v2021_v36, %v2025_v39  ;;  %3033 = vmatprep.subr.bf16.mxu1 %v3231_v56  ;;  %v1963_v25 = vmax.f32 %v1947_v32, 0.0  ;;  %v2008_v0 = vrot.slane %v2006_v7, 1  ;;  %v2077_v21 = vunpack.c.h.b16 %v4448_v35 }
 0x2a0   :  { %v2905_v15 = vcombine.low %v2002_v57, %v2026_v10  ;;  %2557 = vmatprep.mubr.bf16.mxu1 %v2198_v9  ;;  %v2044_v53 = vrot.slane %v4420_v30, 1  ;;  %v2045_v45 = vrot.slane %v4426_v11, 1  ;;  %v1997_v41 = vshrl.u32 %v4441_v23, 16  ;;  %v3235_v30 = vld [vmem:[#allocation5 + $0x150] sm:$0xff]  }
 0x2a1   :  { %v4460_v63 = vpack.c.bf16 %v1963_v25, %v1961_v18  ;;  %v2032_v47 = vor.u32 %v2030_v33, %v2025_v39  ;;  %v2080_v24 = vunpack.c.h.b16 %v2026_v10  ;;  %v2050_v17 = vrot.slane %v4432_v16, 1 }
 0x2a2   :  { %2606 = vmatprep.mubr.bf16.mxu0 %v2905_v15  ;;  %3034 = vmatpush3.bf16.msra.mxu1 %v3232_v5  ;;  %v2009_v26 = vor.u32 %v2008_v0, %v2004_v48  ;;  %v2046_v50 = vsel %vm201_vm1, %v2044_v53, %v2045_v45  ;;  %v1999_v12 = vor.u32 %v1997_v41, %v1983_v2  ;;  %v2051_v1 = vrot.slane %v4418_v28, 1 }
 0x2a3   :  { %v2011_v52 = vshll.u32 %v4460_v63, 16  ;;  %3035 = vmatprep.subr.bf16.mxu1 %v3233_v8  ;;  %v2083_v55 = vunpack.c.l.b16 %v4460_v63  ;;  %v2086_v11 = vunpack.c.l.b16 %v2032_v47  ;;  %v2027_v16 = vshrl.u32 %v4460_v63, 16 }
 0x2a4   :  { %v2052_v51 = vsel %vm201_vm1, %v2050_v17, %v2051_v1  ;;  %v2088_v3 = vunpack.c.l.b16 %v2051_v1  ;;  %v2041_v31 = vrot.slane %v4422_v22, 1  ;;  %v2042_v56 = vrot.slane %v4441_v23, 1 }
 0x2a5   :  { %v2013_v54 = vrot.slane %v2011_v52, 1  ;;  %v2197_v6 = vpack.c.b16 %v2083_v55, %v2077_v21  ;;  %v2200_v19 = vpack.c.b16 %v2086_v11, %v2080_v24  ;;  %v2907_v44 = vcombine.low %v2045_v45, %v2052_v51 }
 0x2a6   :  { %3036 = vmatpush3.bf16.msra.mxu1 %v3234_v49  ;;  %v2082_v58 = vunpack.c.h.b16 %v2052_v51  ;;  %v2043_v2 = vsel %vm201_vm1, %v2041_v31, %v2042_v56  ;;  %v2047_v43 = vrot.slane %v4448_v35, 1  ;;  %v2048_v4 = vrot.slane %v4460_v63, 1 }
 0x2a7   :  { %v2014_v37 = vsel %vm907_vm8, %v2009_v26, %v2013_v54  ;;  %2558 = vmatmul.mubr.bf16.gmra.mxu1 %v2197_v6  ;;  %3037 = vmatprep.subr.bf16.mxu1 %v3235_v30  ;;  %v2029_v28 = vor.u32 %v2027_v16, %v2013_v54 }
 0x2a8   :  { %v2904_v40 = vcombine.low %v1999_v12, %v2014_v37  ;;  %2655 = vmatprep.mubr.bf16.mxu1 %v2046_v50  ;;  %v2202_v46 = vpack.c.b16 %v2088_v3, %v2082_v58  ;;  %v2079_v34 = vunpack.c.h.b16 %v2014_v37  ;;  %v2049_v14 = vsel %vm201_vm1, %v2047_v43, %v2048_v4 }
 0x2a9   :  { %v2085_v27 = vunpack.c.l.b16 %v2029_v28  ;;  %v2906_v36 = vcombine.low %v2042_v56, %v2049_v14  ;;  %v2081_v39 = vunpack.c.h.b16 %v2049_v14  ;;  %v2087_v32 = vunpack.c.l.b16 %v2048_v4 }
 0x2aa   :  { %2607 = vmatmul.mubr.bf16.gmra.mxu0 %v2904_v40  ;;  %3038 = vmatpush3.bf16.msra.mxu1 %v3236_v59  ;;  %v4486_v40 = vsel %vm2682_vm11, 1.0, %v4607_v20 }
 0x2ab   :  { %2614 = vmatprep.mubr.bf16.mxu0 %v2200_v19  ;;  %3039 = vmatprep.subr.bf16.mxu1 %v3237_v60  ;;  %v2199_v57 = vpack.c.b16 %v2085_v27, %v2079_v34  ;;  %v2201_v22 = vpack.c.b16 %v2087_v32, %v2081_v39 }
 0x2ae   :  { %3040 = vmatpush3.bf16.msra.mxu1 %v3238_v38 }
 0x2af   :  { %3041 = vmatprep.subr.bf16.mxu1 %v3239_v62 }
 0x2b2   :  { %2615 = vmatmul.mubr.bf16.gmra.mxu0 %v2199_v57  ;;  %3042 = vmatpush3.bf16.msra.mxu1 %v3240_v61 }
 0x2b5   :  { %2656 = vmatmul.mubr.bf16.vlgmr.msra.gmra.mxu1 %v2043_v2 }
 0x2b6   :  { %2663 = vmatprep.mubr.bf16.mxu1 %v2907_v44 }
 0x2bd   :  { %2664 = vmatmul.mubr.bf16.gmra.mxu1 %v2906_v36 }
 0x2be   :  { %2671 = vmatprep.mubr.bf16.mxu1 %v2202_v46 }
 0x2c5   :  { %2672 = vmatmul.mubr.bf16.gmra.mxu1 %v2201_v22 }
 0x355   :  { %v2975_v23 = vpop.f32.mrf.mxu1 }
 0x357   :  { %v2976_v13 = vpop.f32.mrf.mxu1 }
 0x358   :  { %v2977_v1 = vadd.f32 %v2976_v13, %v2975_v23 }
 0x359   :  { %v2978_v9 = vpop.f32.mrf.mxu1 }
 0x35b   :  { %v2979_v5 = vpop.f32.mrf.mxu1 }
 0x35c   :  { %v2980_v55 = vadd.f32 %v2979_v5, %v2978_v9 }
 0x35d   :  { %v2981_v18 = vpop.f32.mrf.mxu1 }
 0x35f   :  { %v3009_v7 = vpop.f32.mrf.mxu0  ;;  %v2982_v35 = vpop.f32.mrf.mxu1 }
 0x360   :  { %v2983_v59 = vadd.f32 %v2982_v35, %v2981_v18 }
 0x361   :  { %v3010_v10 = vpop.f32.mrf.mxu0  ;;  %v2984_v25 = vpop.f32.mrf.mxu1 }
 0x362   :  { %v3011_v50 = vadd.f32 %v3010_v10, %v3009_v7 }
 0x363   :  { %v3012_v8 = vpop.f32.mrf.mxu0  ;;  %v2985_v15 = vpop.f32.mrf.mxu1 }
 0x364   :  { %v2601_v51 = vadd.f32 %v3011_v50, %v2977_v1  ;;  %v2986_v39 = vadd.f32 %v2985_v15, %v2984_v25 }
 0x365   :  { %v3013_v48 = vpop.f32.mrf.mxu0 }
 0x366   :  { %v3014_v17 = vadd.f32 %v3013_v48, %v3012_v8 }
 0x367   :  { %v2987_v0 = vpop.f32.mrf.mxu1 }
 0x368   :  { %v2604_v54 = vadd.f32 %v3014_v17, %v2980_v55 }
 0x369   :  { %v2988_v63 = vpop.f32.mrf.mxu1 }
 0x36a   :  { %v3015_v33 = vpop.f32.mrf.mxu0  ;;  %v2989_v2 = vadd.f32 %v2988_v63, %v2987_v0 }
 0x36b   :  { %v2990_v53 = vpop.f32.mrf.mxu1 }
 0x36c   :  { %v3016_v21 = vpop.f32.mrf.mxu0 }
 0x36d   :  { %v2991_v41 = vpop.f32.mrf.mxu1  ;;  %v3017_v12 = vadd.f32 %v3016_v21, %v3015_v33 }
 0x36e   :  { %v3018_v45 = vpop.f32.mrf.mxu0  ;;  %v2992_v7 = vadd.f32 %v2991_v41, %v2990_v53 }
 0x36f   :  { %v2609_v60 = vadd.f32 %v3017_v12, %v2983_v59 }
 0x370   :  { %v3019_v24 = vpop.f32.mrf.mxu0 }
 0x371   :  { %v3020_v43 = vadd.f32 %v3019_v24, %v3018_v45 }
 0x372   :  { %v3021_v52 = vpop.f32.mrf.mxu0 }
 0x373   :  { %v2612_v18 = vadd.f32 %v3020_v43, %v2986_v39  ;;  %v2740_v43 = vld [vmem:[%s4522_s6] sm:$0x1] }
 0x374   :  { %v3022_v16 = vpop.f32.mrf.mxu0 }
 0x375   :  { %v3043_v47 = vpop.f32.mrf.mxu1  ;;  %v3023_v27 = vadd.f32 %v3022_v16, %v3021_v52 }
 0x376   :  { %v3024_v46 = vpop.f32.mrf.mxu0 }
 0x377   :  { %v3044_v49 = vpop.f32.mrf.mxu1  ;;  %v2617_v22 = vadd.f32 %v3023_v27, %v2989_v2 }
 0x378   :  { %v3045_v6 = vadd.f32 %v3044_v49, %v3043_v47  ;;  %v3025_v31 = vpop.f32.mrf.mxu0 }
 0x379   :  { %v3046_v26 = vpop.f32.mrf.mxu1  ;;  %v3026_v23 = vadd.f32 %v3025_v31, %v3024_v46 }
 0x37a   :  { %v4483_v58 = vadd.f32 %v3045_v6, %v2601_v51 }
 0x37b   :  { %v3047_v30 = vpop.f32.mrf.mxu1  ;;  %v2620_v48 = vadd.f32 %v3026_v23, %v2992_v7 }
 0x37c   :  { %v3048_v11 = vadd.f32 %v3047_v30, %v3046_v26  ;;  %v2712_v61 = vmul.f32 %v4483_v58, %v4483_v58 }
 0x37d   :  { %v3049_v19 = vpop.f32.mrf.mxu1 }
 0x37e   :  { %v4481_v3 = vadd.f32 %v3048_v11, %v2604_v54 }
 0x37f   :  { %v3050_v37 = vpop.f32.mrf.mxu1 }
 0x380   :  { %v3051_v44 = vadd.f32 %v3050_v37, %v3049_v19  ;;  %v2713_v62 = vmul.f32 %v4481_v3, %v4481_v3  ;;  %v2695_v57 = vadd.f32 %v4481_v3, %v4483_v58 }
 0x381   :  { %v3052_v28 = vpop.f32.mrf.mxu1 }
 0x382   :  { %v4488_v38 = vadd.f32 %v3051_v44, %v2609_v60  ;;  %v2718_v4 = vadd.f32 %v2713_v62, %v2712_v61 }
 0x383   :  { %v3053_v34 = vpop.f32.mrf.mxu1 }
 0x384   :  { %v2691_v29 = vmul.f32 %v4486_v40, %v4488_v38  ;;  %v3054_v9 = vadd.f32 %v3053_v34, %v3052_v28 }
 0x385   :  { %v3055_v20 = vpop.f32.mrf.mxu1 }
 0x386   :  { %v2714_v56 = vmul.f32 %v2691_v29, %v4488_v38  ;;  %v2696_v14 = vadd.f32 %v2695_v57, %v2691_v29  ;;  %v2669_v21 = vadd.f32 %v3054_v9, %v2612_v18 }
 0x387   :  { %v3056_v36 = vpop.f32.mrf.mxu1 }
 0x388   :  { %v3057_v32 = vadd.f32 %v3056_v36, %v3055_v20  ;;  %v2719_v13 = vadd.f32 %v2718_v4, %v2714_v56  ;;  %v2697_v35 = vrot.slane %v2696_v14, 4  ;;  %v2715_v25 = vmul.f32 %v2669_v21, %v2669_v21  ;;  %v2741_v36 = vld [vmem:[%s4522_s6 + $0x1] sm:$0x1]  ;;  %s3324_s6 = smov [#allocation7]  }
 0x389   :  { %v3058_v5 = vpop.f32.mrf.mxu1  ;;  %s2809_s26 = sshll.u32 %s3324_s6, 4  ;;  %s2810_s26 = int_to_ptr.vmem [resolvable:$true] %s2809_s26 }
 0x38a   :  { %v2674_v10 = vadd.f32 %v3057_v32, %v2617_v22  ;;  %v2720_v33 = vrot.slane %v2719_v13, 4  ;;  %v2698_v63 = vadd.f32 %v2697_v35, %v2696_v14  ;;  %s3289_s27 = scalar_lea.vmem %s2810_s26, 32  ;;  %p3294_p11 = scmp.lt.s32.totalorder %s2810_s26, %s2810_s26 }
 0x38b   :  { %v3059_v8 = vpop.f32.mrf.mxu1  ;;  %p3290_p10 = scmp.ne.s32.totalorder %s2810_s26, %s3289_s27  ;;  %p3295_p12 = scmp.lt.s32.totalorder %s3289_s27, %s3289_s27 }
 0x38c   :  { %v3060_v0 = vadd.f32 %v3059_v8, %v3058_v5  ;;  %v2716_v45 = vmul.f32 %v2674_v10, %v2674_v10  ;;  %v2721_v24 = vadd.f32 %v2720_v33, %v2719_v13  ;;  %v2703_v15 = vadd.f32 %v2674_v10, %v2669_v21 }
 0x38d   :  { %v2699_v17 = vrot.slane %v2698_v63, 2  ;;  %p3296_p13 = por %p3295_p12, %p3294_p11 }
 0x38e   :  { %v2677_v47 = vadd.f32 %v3060_v0, %v2620_v48  ;;  %v2726_v26 = vadd.f32 %v2716_v45, %v2715_v25  ;;  %v2722_v53 = vrot.slane %v2721_v24, 2 }
 0x38f   :  { %v2700_v30 = vadd.f32 %v2699_v17, %v2698_v63  ;;  %p3297_p0 = pnand %p3296_p13, %p3290_p10 }
 0x390   :  { %v2694_v49 = vmul.f32 %v4486_v40, %v2677_v47  ;;  %v2723_v1 = vadd.f32 %v2722_v53, %v2721_v24 }
 0x391   :  { %v2701_v19 = vrot.slane %v2700_v30, 1 }
 0x392   :  { %v2704_v52 = vadd.f32 %v2703_v15, %v2694_v49  ;;  %v2717_v55 = vmul.f32 %v2694_v49, %v2677_v47  ;;  %v2724_v51 = vrot.slane %v2723_v1, 1 }
 0x393   :  { %v2702_v44 = vadd.f32 %v2701_v19, %v2700_v30 }
 0x394   :  { %v2705_v41 = vrot.slane %v2704_v52, 4  ;;  %v2727_v50 = vadd.f32 %v2726_v26, %v2717_v55  ;;  %v2725_v62 = vadd.f32 %v2724_v51, %v2723_v1 }
 0x396   :  { %v2706_v12 = vadd.f32 %v2705_v41, %v2704_v52  ;;  %v2728_v11 = vrot.slane %v2727_v50, 4 }
 0x398   :  { %v2707_v54 = vrot.slane %v2706_v12, 2  ;;  %v2729_v6 = vadd.f32 %v2728_v11, %v2727_v50 }
 0x39a   :  { %v2708_v59 = vadd.f32 %v2707_v54, %v2706_v12  ;;  %v2730_v16 = vrot.slane %v2729_v6, 2 }
 0x39c   :  { %v2709_v37 = vrot.slane %v2708_v59, 1  ;;  %v2731_v60 = vadd.f32 %v2730_v16, %v2729_v6 }
 0x39e   :  { %v2710_v28 = vadd.f32 %v2709_v37, %v2708_v59  ;;  %v2732_v46 = vrot.slane %v2731_v60, 1 }
 0x3a0   :  { %v2711_v34 = vadd.f32 %v2710_v28, %v2702_v44  ;;  %v2733_v29 = vadd.f32 %v2732_v46, %v2731_v60 }
 0x3a2   :  { %v2734_v27 = vadd.f32 %v2733_v29, %v2725_v62  ;;  %v2735_v61 = vmul.f32 0.02631579, %v2711_v34 }
 0x3a4   :  { %v2736_v57 = vmul.f32 0.02631579, %v2734_v27  ;;  %v2737_v20 = vmul.f32 %v2735_v61, %v2735_v61 }
 0x3a6   :  { %v2738_v31 = vsub.f32 %v2736_v57, %v2737_v20 }
 0x3a8   :  { %v2739_v56 = vmax.f32 %v2738_v31, 0.0 }
 0x3aa   :  { %v2742_v2 = vadd.f32 0.001, %v2739_v56 }
 0x3ac   :  { %3247 = vrsqrt.f32 %v2742_v2 }
 0x3b9   :  { %v3248_v4 = vpop.eup %3247 }
 0x3ba   :  { %v2744_v14 = vmul.f32 %v3248_v4, %v2740_v43 }
 0x3bc   :  { %v2745_v39 = vmul.f32 %v2744_v14, %v2735_v61  ;;  %v2750_v32 = vrot.slane %v2744_v14, %v3436_v42 }
 0x3be   :  { %v2746_v22 = vsub.f32 %v2741_v36, %v2745_v39  ;;  %v2754_v23 = vmul.f32 %v2750_v32, %v2669_v21  ;;  %v2755_v13 = vmul.f32 %v2750_v32, %v2674_v10  ;;  %v2756_v9 = vmul.f32 %v2750_v32, %v2677_v47 }
 0x3bf   :  { %v2751_v18 = vmul.f32 %v2750_v32, %v4483_v58  ;;  %v2752_v7 = vmul.f32 %v2750_v32, %v4481_v3  ;;  %v2753_v35 = vmul.f32 %v2750_v32, %v4488_v38 }
 0x3c0   :  { %v2760_v5 = vrot.slane %v2746_v22, %v3436_v42 }
 0x3c2   :  { %v2764_v8 = vadd.f32 %v2760_v5, %v2754_v23  ;;  %v2765_v48 = vadd.f32 %v2760_v5, %v2755_v13  ;;  %v2766_v33 = vadd.f32 %v2760_v5, %v2756_v9  ;;  %v2761_v0 = vadd.f32 %v2760_v5, %v2751_v18 }
 0x3c3   :  { %v2762_v63 = vadd.f32 %v2760_v5, %v2752_v7  ;;  %v2763_v45 = vadd.f32 %v2760_v5, %v2753_v35 }
 0x3c4   :  { %v2770_v24 = vmax.f32 %v2764_v8, 0.0  ;;  %v2771_v25 = vmax.f32 %v2765_v48, 0.0  ;;  %v2772_v15 = vmax.f32 %v2766_v33, 0.0  ;;  %v2767_v21 = vmax.f32 %v2761_v0, 0.0 }
 0x3c5   :  { %v2768_v10 = vmax.f32 %v2762_v63, 0.0  ;;  %v2769_v47 = vmax.f32 %v2763_v45, 0.0 }
 0x3c6   :  { %v2778_v42 = vmul.f32 %v4486_v40, %v2772_v15  ;;  %v2787_v49 = vadd.f32 %v2771_v25, %v2770_v24 }
 0x3c7   :  { %v2775_v58 = vmul.f32 %v4486_v40, %v2769_v47  ;;  %v2779_v3 = vadd.f32 %v2768_v10, %v2767_v21 }
 0x3c8   :  { %v2788_v17 = vadd.f32 %v2787_v49, %v2778_v42 }
 0x3c9   :  { %v2780_v38 = vadd.f32 %v2779_v3, %v2775_v58 }
 0x3ca   :  { %v2789_v26 = vrot.slane %v2788_v17, 4 }
 0x3cb   :  { %v2781_v52 = vrot.slane %v2780_v38, 4 }
 0x3cc   :  { %v2790_v55 = vadd.f32 %v2789_v26, %v2788_v17 }
 0x3cd   :  { %v2782_v53 = vadd.f32 %v2781_v52, %v2780_v38 }
 0x3ce   :  { %v2791_v41 = vrot.slane %v2790_v55, 2 }
 0x3cf   :  { %v2783_v50 = vrot.slane %v2782_v53, 2 }
 0x3d0   :  { %v2792_v30 = vadd.f32 %v2791_v41, %v2790_v55 }
 0x3d1   :  { %v2784_v12 = vadd.f32 %v2783_v50, %v2782_v53 }
 0x3d2   :  { %v2793_v11 = vrot.slane %v2792_v30, 1 }
 0x3d3   :  { %v2785_v1 = vrot.slane %v2784_v12, 1 }
 0x3d4   :  { %v2794_v54 = vadd.f32 %v2793_v11, %v2792_v30 }
 0x3d5   :  { %v2786_v6 = vadd.f32 %v2785_v1, %v2784_v12 }
 0x3d6   :  { %v2796_v19 = vmul.f32 0.05263158, %v2794_v54 }
 0x3d7   :  { %v2795_v40 = vmul.f32 0.05263158, %v2786_v6 }
 0x3d9   :  { %v2800_v59 = vsel %vm2799_vm12, %v2796_v19, %v2795_v40 }
 0x3da   :  { %2802 = vst [vmem:[#allocation7] sm:$0x3] %v2800_v59 }
 0x3db   :  { %3300 = shalt.err (!%p3297_p0)
}
 0x3dc   :  { %2812 = dma.vmem_to_hbm [thread:$0]  %s2810_s26, 32, %s4523_s7, [#allocation4]  }
 0x3dd   :  { %3313 = dma.done.wait [#allocation4], 32  }
 0x3de   :  { %3314 = vsyncadd [#allocation4], 4294967264 }
 0x3df   :  { %2816 = vsyncpa [#allocation3], 1 }
 0x3e0   :  { %2817 = vsyncpa [#allocation6], 1 }
 0x3e1   :  { %2818 = vsyncpa [#allocation4], 1 }

</bundles_post_ra>
